<compile_context>
chip_gen: v7x
topology: tpu7x:2x2x1
jax: 0.10.0
libtpu: 0.0.40
codegen_flags: <defaults>
</compile_context>

<pallas_src>
import functools

import jax
import jax.numpy as jnp
import numpy as np
from jax import lax
from jax.experimental import pallas as pl
from jax.experimental.pallas import tpu as pltpu


def _round_up(x, m):
    return (x + m - 1) // m * m


def _conv_relu_kernel(x_ref, w_ref, b_ref, o_ref, *, ksize, dilation, oh, owp):
    """One batch block per grid step: KH*KW accumulated MXU dots + bias + ReLU.

    x_ref: (B_BLK, H, Wp, Cin)  f32  VMEM   (W zero-padded to OWp + d*(KW-1))
    w_ref: (KH*KW, Cin, Cout_pad) bf16 VMEM (tap-major (kh, kw) row order)
    b_ref: (1, Cout_pad)        f32  VMEM
    o_ref: (B_BLK, OH*OWp, Cout_pad) VMEM   (lane-dense stores)
    """
    bblk, _, _, cin = x_ref.shape
    cout_pad = o_ref.shape[-1]
    m = bblk * oh * owp

    acc = None
    for kh in range(ksize):
        for kw in range(ksize):
            h0 = kh * dilation
            w0 = kw * dilation
            # Tight tap window from the Ref; collapsing (B, OH, OWp) -> M only
            # touches leading dims (OWp % 8 == 0, Cin stays minor), so there is
            # no lane interleave and no sublane repack before the MXU.
            tap = x_ref[:, h0:h0 + oh, w0:w0 + owp, :]
            tap = tap.reshape(m, cin).astype(jnp.bfloat16)
            part = jnp.dot(tap, w_ref[kh * ksize + kw],
                           preferred_element_type=jnp.float32)
            acc = part if acc is None else acc + part

    # Fused bias + ReLU epilogue on the f32 accumulator (no bf16 VPU needed).
    acc = jnp.maximum(acc + b_ref[...], 0.0)
    o_ref[...] = acc.reshape(bblk, oh * owp, cout_pad).astype(o_ref.dtype)


def prepare_conv_params(weight, bias):
    """Pack PyTorch (Cout, Cin, KH, KW) conv parameters ONCE at load time.

    Returns:
      w_packed: (KH*KW, Cin, Cout_pad) bfloat16, tap-major (kh, kw) order
      b_packed: (1, Cout_pad) float32
    Cout_pad is a multiple of 128 (256 granularity when Cout > 128 so v6e/v7x
    MXU tiles are full width); the zero columns ReLU to zero and are sliced off
    only at the PyTorch-layout boundary.
    """
    cout, cin, kh, kw = weight.shape
    lane_tile = 256 if cout > 128 else 128
    cout_pad = _round_up(cout, lane_tile)
    w = jnp.transpose(weight, (2, 3, 1, 0)).reshape(kh * kw, cin, cout)
    w = jnp.pad(w, ((0, 0), (0, 0), (0, cout_pad - cout))).astype(jnp.bfloat16)
    b = jnp.pad(bias, (0, cout_pad - cout)).astype(jnp.float32).reshape(1, cout_pad)
    return w, b


def _pick_batch_block(n, h, wp, cin, oh, owp, cout_pad, itemsize,
                      m_target=512, vmem_budget_bytes=24 << 20):
    """Largest batch block that divides N, fits a double-buffered VMEM budget,
    and lands near the ~512-row M target; also returns an explicit
    vmem_limit_bytes (v5e scoped default is 16 MiB, v7x has 64 MiB physical)."""
    # Tiled-layout footprint per image (sublane pad to 8, lane pad to 128).
    in_img = h * _round_up(wp, 8) * _round_up(cin, 128) * itemsize
    out_img = oh * owp * cout_pad * itemsize
    per_img = 2 * (in_img + out_img)  # x2: input/output double buffering
    b = max(1, min(n, -(-m_target // (oh * owp))))
    b = max(1, min(b, vmem_budget_bytes // max(per_img, 1)))
    while n % b:
        b -= 1
    vmem_limit = int(min(48 << 20, max(16 << 20, 2 * b * per_img)))
    return int(b), vmem_limit


def basic_conv2d_nhwc(x_nhwc, w_packed, b_packed, *, kernel_size,
                      stride=1, dilation=1):
    """ReLU(Conv2d(x) + bias), valid padding. NHWC in, padded NHWC out.

    Returns (N, OH, OWp, Cout_pad) with OWp = round_up(OW, 8); padding columns
    are zeros after ReLU.  Keep this lane-dense layout as the inter-layer
    activation format; slice [..., :OW, :nout] only at the PyTorch boundary.
    """
    # TODO(synk): stride > 1 needs ref-level strided slicing (pl.ds(..., stride=))
    # or a phase-decomposed input layout; the unvalidated value-level ::stride
    # path from the previous revision was removed per review.
    assert stride == 1, "Pallas path implements the module's default stride=1"
    N, H, W, Cin = x_nhwc.shape
    KH = KW = kernel_size
    OH = (H - dilation * (KH - 1) - 1) // stride + 1
    OW = (W - dilation * (KW - 1) - 1) // stride + 1
    OWp = _round_up(OW, 8)
    Wp = OWp + dilation * (KW - 1)
    T, cin_w, cout_pad = w_packed.shape
    assert T == KH * KW and cin_w == Cin

    if Wp > W:  # spatial pad so every tap window is OWp wide (8-aligned M)
        x_nhwc = jnp.pad(x_nhwc, ((0, 0), (0, 0), (0, Wp - W), (0, 0)))

    itemsize = jnp.dtype(x_nhwc.dtype).itemsize
    b_blk, vmem_limit = _pick_batch_block(N, H, Wp, Cin, OH, OWp, cout_pad,
                                          itemsize)

    kernel = functools.partial(_conv_relu_kernel, ksize=kernel_size,
                               dilation=dilation, oh=OH, owp=OWp)

    out_flat = pl.pallas_call(
        kernel,
        out_shape=jax.ShapeDtypeStruct((N, OH * OWp, cout_pad), x_nhwc.dtype),
        grid_spec=pltpu.PrefetchScalarGridSpec(
            num_scalar_prefetch=0,
            # Batch blocks: auto double-buffered; "parallel" shards across
            # TensorCores (v7x megacore).  With larger N this yields both
            # M >= 512 per dot and >= 2 grid steps per core.
            grid=(N // b_blk,),
            in_specs=[
                pl.BlockSpec((b_blk, H, Wp, Cin), lambda n: (n, 0, 0, 0)),
                pl.BlockSpec((T, Cin, cout_pad), lambda n: (0, 0, 0)),
                pl.BlockSpec((1, cout_pad), lambda n: (0, 0)),
            ],
            out_specs=pl.BlockSpec((b_blk, OH * OWp, cout_pad),
                                   lambda n: (n, 0, 0)),
        ),
        compiler_params=pltpu.CompilerParams(
            dimension_semantics=("parallel",),
            vmem_limit_bytes=vmem_limit),
    )(x_nhwc, w_packed, b_packed)

    return out_flat.reshape(N, OH, OWp, cout_pad)


def basic_conv2d_nchw(x_nchw, w_packed, b_packed, *, kernel_size, nout,
                      stride=1, dilation=1):
    """PyTorch-layout boundary: NCHW in/out.  The transposes and the unpad
    slice are layout plumbing that disappears if the padded NHWC format is used
    as the canonical inter-layer activation layout."""
    _, _, H, W = x_nchw.shape
    OH = (H - dilation * (kernel_size - 1) - 1) // stride + 1
    OW = (W - dilation * (kernel_size - 1) - 1) // stride + 1
    x_nhwc = jnp.transpose(x_nchw, (0, 2, 3, 1))
    y = basic_conv2d_nhwc(x_nhwc, w_packed, b_packed, kernel_size=kernel_size,
                          stride=stride, dilation=dilation)
    y = y[:, :OH, :OW, :nout]
    return jnp.transpose(y, (0, 3, 1, 2))


def _reference(x_nchw, weight, bias, *, stride, dilation):
    # Mirror the kernel's bf16 MXU operands (with f32 accumulation) so the
    # comparison is apples-to-apples; residual differences are accumulation
    # order only.
    xb = x_nchw.astype(jnp.bfloat16).astype(jnp.float32)
    wb = weight.astype(jnp.bfloat16).astype(jnp.float32)
    y = lax.conv_general_dilated(
        xb, wb,
        window_strides=(stride, stride),
        padding="VALID",
        rhs_dilation=(dilation, dilation),
        dimension_numbers=("NCHW", "OIHW", "NCHW"),
        precision=lax.Precision.HIGHEST,
    )
    y = y + bias.reshape(1, -1, 1, 1)
    return jnp.maximum(y, 0.0)


if __name__ == "__main__":
    # BasicConv2d(nin=4, nout=8, kernel_size=3) -> bias=True, no BN, ReLU.
    nin, nout, ksize = 4, 8, 3
    N, H, W = 2, 16, 16

    key = jax.random.PRNGKey(0)
    kx, kw, kb = jax.random.split(key, 3)
    x = jax.random.normal(kx, (N, nin, H, W), dtype=jnp.float32)
    fan_in = nin * ksize * ksize
    weight = jax.random.normal(kw, (nout, nin, ksize, ksize),
                               dtype=jnp.float32) / np.sqrt(fan_in)
    bias = jax.random.normal(kb, (nout,), dtype=jnp.float32) * 0.1

    # Parameter packing hoisted: done once at "load time", not per forward call.
    w_packed, b_packed = prepare_conv_params(weight, bias)

    fwd = jax.jit(functools.partial(
        basic_conv2d_nchw, kernel_size=ksize, nout=nout, stride=1, dilation=1))
    out = fwd(x, w_packed, b_packed)
    out = jax.block_until_ready(out)

    ref = _reference(x, weight, bias, stride=1, dilation=1)
    assert out.shape == (N, nout, H - ksize + 1, W - ksize + 1), out.shape
    np.testing.assert_allclose(np.asarray(out), np.asarray(ref),
                               rtol=1e-3, atol=1e-3)

    print("KERNEL_OK")
</pallas_src>

<mosaic_0001>
module attributes {stable_mosaic.version = 11 : i64} {
  func.func @_conv_relu_kernel(%arg0: i32, %arg1: memref<2x16x18x4xf32, #tpu.memory_space<vmem>>, %arg2: memref<9x4x128xbf16, #tpu.memory_space<vmem>>, %arg3: memref<1x128xf32, #tpu.memory_space<vmem>>, %arg4: memref<2x224x128xf32, #tpu.memory_space<vmem>>) attributes {dimension_semantics = [#tpu.dimension_semantics<parallel>], iteration_bounds = array<i64: 1>, scalar_prefetch = 0 : i64, scratch_operands = 0 : i64, tpu.core_type = #tpu.core_type<tc>, window_params = [{transform_indices = @transform_0, window_bounds = array<i64: 2, 16, 18, 4>}, {pipeline_mode = #tpu.pipeline_mode<synchronous>, transform_indices = @transform_1, window_bounds = array<i64: 9, 4, 128>}, {pipeline_mode = #tpu.pipeline_mode<synchronous>, transform_indices = @transform_2, window_bounds = array<i64: 1, 128>}, {transform_indices = @transform_3, window_bounds = array<i64: 2, 224, 128>}]} {
    %c0 = arith.constant 0 : index
    %c0_0 = arith.constant 0 : index
    %c0_1 = arith.constant 0 : index
    %c0_2 = arith.constant 0 : index
    %0 = vector.load %arg1[%c0, %c0_0, %c0_1, %c0_2] : memref<2x16x18x4xf32, #tpu.memory_space<vmem>>, vector<2x14x16x4xf32>
    %1 = vector.shape_cast %0 : vector<2x14x16x4xf32> to vector<448x4xf32>
    %2 = arith.truncf %1 : vector<448x4xf32> to vector<448x4xbf16>
    %c0_3 = arith.constant 0 : index
    %c0_4 = arith.constant 0 : index
    %c0_5 = arith.constant 0 : index
    %3 = vector.load %arg2[%c0_3, %c0_4, %c0_5] : memref<9x4x128xbf16, #tpu.memory_space<vmem>>, vector<1x4x128xbf16>
    %4 = vector.shape_cast %3 : vector<1x4x128xbf16> to vector<4x128xbf16>
    %cst = arith.constant dense<0.000000e+00> : vector<448x128xf32>
    %5 = tpu.matmul %2, %4, %cst {dimension_numbers = #tpu.dot_dimension_numbers<[1], [0], [0], [1], [0, 0, 1, 1], [], []>} : vector<448x4xbf16>, vector<4x128xbf16>, vector<448x128xf32> -> vector<448x128xf32>
    %c0_6 = arith.constant 0 : index
    %c0_7 = arith.constant 0 : index
    %c1 = arith.constant 1 : index
    %c0_8 = arith.constant 0 : index
    %6 = vector.load %arg1[%c0_6, %c0_7, %c1, %c0_8] : memref<2x16x18x4xf32, #tpu.memory_space<vmem>>, vector<2x14x16x4xf32>
    %7 = vector.shape_cast %6 : vector<2x14x16x4xf32> to vector<448x4xf32>
    %8 = arith.truncf %7 : vector<448x4xf32> to vector<448x4xbf16>
    %c1_9 = arith.constant 1 : index
    %c0_10 = arith.constant 0 : index
    %c0_11 = arith.constant 0 : index
    %9 = vector.load %arg2[%c1_9, %c0_10, %c0_11] : memref<9x4x128xbf16, #tpu.memory_space<vmem>>, vector<1x4x128xbf16>
    %10 = vector.shape_cast %9 : vector<1x4x128xbf16> to vector<4x128xbf16>
    %cst_12 = arith.constant dense<0.000000e+00> : vector<448x128xf32>
    %11 = tpu.matmul %8, %10, %cst_12 {dimension_numbers = #tpu.dot_dimension_numbers<[1], [0], [0], [1], [0, 0, 1, 1], [], []>} : vector<448x4xbf16>, vector<4x128xbf16>, vector<448x128xf32> -> vector<448x128xf32>
    %12 = arith.addf %5, %11 : vector<448x128xf32>
    %c0_13 = arith.constant 0 : index
    %c0_14 = arith.constant 0 : index
    %c2 = arith.constant 2 : index
    %c0_15 = arith.constant 0 : index
    %13 = vector.load %arg1[%c0_13, %c0_14, %c2, %c0_15] : memref<2x16x18x4xf32, #tpu.memory_space<vmem>>, vector<2x14x16x4xf32>
    %14 = vector.shape_cast %13 : vector<2x14x16x4xf32> to vector<448x4xf32>
    %15 = arith.truncf %14 : vector<448x4xf32> to vector<448x4xbf16>
    %c2_16 = arith.constant 2 : index
    %c0_17 = arith.constant 0 : index
    %c0_18 = arith.constant 0 : index
    %16 = vector.load %arg2[%c2_16, %c0_17, %c0_18] : memref<9x4x128xbf16, #tpu.memory_space<vmem>>, vector<1x4x128xbf16>
    %17 = vector.shape_cast %16 : vector<1x4x128xbf16> to vector<4x128xbf16>
    %cst_19 = arith.constant dense<0.000000e+00> : vector<448x128xf32>
    %18 = tpu.matmul %15, %17, %cst_19 {dimension_numbers = #tpu.dot_dimension_numbers<[1], [0], [0], [1], [0, 0, 1, 1], [], []>} : vector<448x4xbf16>, vector<4x128xbf16>, vector<448x128xf32> -> vector<448x128xf32>
    %19 = arith.addf %12, %18 : vector<448x128xf32>
    %c0_20 = arith.constant 0 : index
    %c1_21 = arith.constant 1 : index
    %c0_22 = arith.constant 0 : index
    %c0_23 = arith.constant 0 : index
    %20 = vector.load %arg1[%c0_20, %c1_21, %c0_22, %c0_23] : memref<2x16x18x4xf32, #tpu.memory_space<vmem>>, vector<2x14x16x4xf32>
    %21 = vector.shape_cast %20 : vector<2x14x16x4xf32> to vector<448x4xf32>
    %22 = arith.truncf %21 : vector<448x4xf32> to vector<448x4xbf16>
    %c3 = arith.constant 3 : index
    %c0_24 = arith.constant 0 : index
    %c0_25 = arith.constant 0 : index
    %23 = vector.load %arg2[%c3, %c0_24, %c0_25] : memref<9x4x128xbf16, #tpu.memory_space<vmem>>, vector<1x4x128xbf16>
    %24 = vector.shape_cast %23 : vector<1x4x128xbf16> to vector<4x128xbf16>
    %cst_26 = arith.constant dense<0.000000e+00> : vector<448x128xf32>
    %25 = tpu.matmul %22, %24, %cst_26 {dimension_numbers = #tpu.dot_dimension_numbers<[1], [0], [0], [1], [0, 0, 1, 1], [], []>} : vector<448x4xbf16>, vector<4x128xbf16>, vector<448x128xf32> -> vector<448x128xf32>
    %26 = arith.addf %19, %25 : vector<448x128xf32>
    %c0_27 = arith.constant 0 : index
    %c1_28 = arith.constant 1 : index
    %c1_29 = arith.constant 1 : index
    %c0_30 = arith.constant 0 : index
    %27 = vector.load %arg1[%c0_27, %c1_28, %c1_29, %c0_30] : memref<2x16x18x4xf32, #tpu.memory_space<vmem>>, vector<2x14x16x4xf32>
    %28 = vector.shape_cast %27 : vector<2x14x16x4xf32> to vector<448x4xf32>
    %29 = arith.truncf %28 : vector<448x4xf32> to vector<448x4xbf16>
    %c4 = arith.constant 4 : index
    %c0_31 = arith.constant 0 : index
    %c0_32 = arith.constant 0 : index
    %30 = vector.load %arg2[%c4, %c0_31, %c0_32] : memref<9x4x128xbf16, #tpu.memory_space<vmem>>, vector<1x4x128xbf16>
    %31 = vector.shape_cast %30 : vector<1x4x128xbf16> to vector<4x128xbf16>
    %cst_33 = arith.constant dense<0.000000e+00> : vector<448x128xf32>
    %32 = tpu.matmul %29, %31, %cst_33 {dimension_numbers = #tpu.dot_dimension_numbers<[1], [0], [0], [1], [0, 0, 1, 1], [], []>} : vector<448x4xbf16>, vector<4x128xbf16>, vector<448x128xf32> -> vector<448x128xf32>
    %33 = arith.addf %26, %32 : vector<448x128xf32>
    %c0_34 = arith.constant 0 : index
    %c1_35 = arith.constant 1 : index
    %c2_36 = arith.constant 2 : index
    %c0_37 = arith.constant 0 : index
    %34 = vector.load %arg1[%c0_34, %c1_35, %c2_36, %c0_37] : memref<2x16x18x4xf32, #tpu.memory_space<vmem>>, vector<2x14x16x4xf32>
    %35 = vector.shape_cast %34 : vector<2x14x16x4xf32> to vector<448x4xf32>
    %36 = arith.truncf %35 : vector<448x4xf32> to vector<448x4xbf16>
    %c5 = arith.constant 5 : index
    %c0_38 = arith.constant 0 : index
    %c0_39 = arith.constant 0 : index
    %37 = vector.load %arg2[%c5, %c0_38, %c0_39] : memref<9x4x128xbf16, #tpu.memory_space<vmem>>, vector<1x4x128xbf16>
    %38 = vector.shape_cast %37 : vector<1x4x128xbf16> to vector<4x128xbf16>
    %cst_40 = arith.constant dense<0.000000e+00> : vector<448x128xf32>
    %39 = tpu.matmul %36, %38, %cst_40 {dimension_numbers = #tpu.dot_dimension_numbers<[1], [0], [0], [1], [0, 0, 1, 1], [], []>} : vector<448x4xbf16>, vector<4x128xbf16>, vector<448x128xf32> -> vector<448x128xf32>
    %40 = arith.addf %33, %39 : vector<448x128xf32>
    %c0_41 = arith.constant 0 : index
    %c2_42 = arith.constant 2 : index
    %c0_43 = arith.constant 0 : index
    %c0_44 = arith.constant 0 : index
    %41 = vector.load %arg1[%c0_41, %c2_42, %c0_43, %c0_44] : memref<2x16x18x4xf32, #tpu.memory_space<vmem>>, vector<2x14x16x4xf32>
    %42 = vector.shape_cast %41 : vector<2x14x16x4xf32> to vector<448x4xf32>
    %43 = arith.truncf %42 : vector<448x4xf32> to vector<448x4xbf16>
    %c6 = arith.constant 6 : index
    %c0_45 = arith.constant 0 : index
    %c0_46 = arith.constant 0 : index
    %44 = vector.load %arg2[%c6, %c0_45, %c0_46] : memref<9x4x128xbf16, #tpu.memory_space<vmem>>, vector<1x4x128xbf16>
    %45 = vector.shape_cast %44 : vector<1x4x128xbf16> to vector<4x128xbf16>
    %cst_47 = arith.constant dense<0.000000e+00> : vector<448x128xf32>
    %46 = tpu.matmul %43, %45, %cst_47 {dimension_numbers = #tpu.dot_dimension_numbers<[1], [0], [0], [1], [0, 0, 1, 1], [], []>} : vector<448x4xbf16>, vector<4x128xbf16>, vector<448x128xf32> -> vector<448x128xf32>
    %47 = arith.addf %40, %46 : vector<448x128xf32>
    %c0_48 = arith.constant 0 : index
    %c2_49 = arith.constant 2 : index
    %c1_50 = arith.constant 1 : index
    %c0_51 = arith.constant 0 : index
    %48 = vector.load %arg1[%c0_48, %c2_49, %c1_50, %c0_51] : memref<2x16x18x4xf32, #tpu.memory_space<vmem>>, vector<2x14x16x4xf32>
    %49 = vector.shape_cast %48 : vector<2x14x16x4xf32> to vector<448x4xf32>
    %50 = arith.truncf %49 : vector<448x4xf32> to vector<448x4xbf16>
    %c7 = arith.constant 7 : index
    %c0_52 = arith.constant 0 : index
    %c0_53 = arith.constant 0 : index
    %51 = vector.load %arg2[%c7, %c0_52, %c0_53] : memref<9x4x128xbf16, #tpu.memory_space<vmem>>, vector<1x4x128xbf16>
    %52 = vector.shape_cast %51 : vector<1x4x128xbf16> to vector<4x128xbf16>
    %cst_54 = arith.constant dense<0.000000e+00> : vector<448x128xf32>
    %53 = tpu.matmul %50, %52, %cst_54 {dimension_numbers = #tpu.dot_dimension_numbers<[1], [0], [0], [1], [0, 0, 1, 1], [], []>} : vector<448x4xbf16>, vector<4x128xbf16>, vector<448x128xf32> -> vector<448x128xf32>
    %54 = arith.addf %47, %53 : vector<448x128xf32>
    %c0_55 = arith.constant 0 : index
    %c2_56 = arith.constant 2 : index
    %c2_57 = arith.constant 2 : index
    %c0_58 = arith.constant 0 : index
    %55 = vector.load %arg1[%c0_55, %c2_56, %c2_57, %c0_58] : memref<2x16x18x4xf32, #tpu.memory_space<vmem>>, vector<2x14x16x4xf32>
    %56 = vector.shape_cast %55 : vector<2x14x16x4xf32> to vector<448x4xf32>
    %57 = arith.truncf %56 : vector<448x4xf32> to vector<448x4xbf16>
    %c8 = arith.constant 8 : index
    %c0_59 = arith.constant 0 : index
    %c0_60 = arith.constant 0 : index
    %58 = vector.load %arg2[%c8, %c0_59, %c0_60] : memref<9x4x128xbf16, #tpu.memory_space<vmem>>, vector<1x4x128xbf16>
    %59 = vector.shape_cast %58 : vector<1x4x128xbf16> to vector<4x128xbf16>
    %cst_61 = arith.constant dense<0.000000e+00> : vector<448x128xf32>
    %60 = tpu.matmul %57, %59, %cst_61 {dimension_numbers = #tpu.dot_dimension_numbers<[1], [0], [0], [1], [0, 0, 1, 1], [], []>} : vector<448x4xbf16>, vector<4x128xbf16>, vector<448x128xf32> -> vector<448x128xf32>
    %61 = arith.addf %54, %60 : vector<448x128xf32>
    %c0_62 = arith.constant 0 : index
    %c0_63 = arith.constant 0 : index
    %62 = vector.load %arg3[%c0_62, %c0_63] : memref<1x128xf32, #tpu.memory_space<vmem>>, vector<1x128xf32>
    %63 = vector.broadcast %62 : vector<1x128xf32> to vector<448x128xf32>
    %64 = arith.addf %61, %63 : vector<448x128xf32>
    %cst_64 = arith.constant 0.000000e+00 : f32
    %65 = vector.broadcast %cst_64 : f32 to vector<448x128xf32>
    %66 = arith.maximumf %64, %65 : vector<448x128xf32>
    %67 = vector.shape_cast %66 : vector<448x128xf32> to vector<2x224x128xf32>
    %c0_65 = arith.constant 0 : index
    %c0_66 = arith.constant 0 : index
    %c0_67 = arith.constant 0 : index
    %68 = vector.load %arg4[%c0_65, %c0_66, %c0_67] : memref<2x224x128xf32, #tpu.memory_space<vmem>>, vector<2x224x128xf32>
    tpu.vector_store %arg4[%c0_65, %c0_66, %c0_67], %67 {strides = array<i32>} : memref<2x224x128xf32, #tpu.memory_space<vmem>>, vector<2x224x128xf32>,
    return
  }
  func.func @transform_0(%arg0: i32) -> (i32, i32, i32, i32) {
    %c0_i32 = arith.constant 0 : i32
    %c0_i32_0 = arith.constant 0 : i32
    %c0_i32_1 = arith.constant 0 : i32
    %c0_i32_2 = arith.constant 0 : i32
    return %arg0, %c0_i32, %c0_i32_0, %c0_i32_1 : i32, i32, i32, i32
  }
  func.func @transform_1(%arg0: i32) -> (i32, i32, i32) {
    %c0_i32 = arith.constant 0 : i32
    %c0_i32_0 = arith.constant 0 : i32
    %c0_i32_1 = arith.constant 0 : i32
    %c0_i32_2 = arith.constant 0 : i32
    return %c0_i32, %c0_i32_0, %c0_i32_1 : i32, i32, i32
  }
  func.func @transform_2(%arg0: i32) -> (i32, i32) {
    %c0_i32 = arith.constant 0 : i32
    %c0_i32_0 = arith.constant 0 : i32
    %c0_i32_1 = arith.constant 0 : i32
    return %c0_i32, %c0_i32_0 : i32, i32
  }
  func.func @transform_3(%arg0: i32) -> (i32, i32, i32) {
    %c0_i32 = arith.constant 0 : i32
    %c0_i32_0 = arith.constant 0 : i32
    %c0_i32_1 = arith.constant 0 : i32
    return %arg0, %c0_i32, %c0_i32_0 : i32, i32, i32
  }
}

</mosaic_0001>

<bundles_post_ra>
// kernel: basic_conv2d_nchw.1
= control target key start
LH: loop header
LB: loop body
LE: loop exit
PB: predicated region body
PF: predicated region fallthrough
CT: control target
= control target key end

     0   :  { %vm271_vm0 = vcmask 1041408   ;;  %vm186_vm1 = vcmask 31744   ;;  %s8115_s1 = inlined_call_operand.vmem [shape: bf16[9,4,128], index: 1, kind: input, shape index: {}]   ;;  %s8116_s0 = inlined_call_operand.vmem [shape: f32[2,16,18,4], index: 0, kind: input, shape index: {}]   ;;  %s8117_s2 = inlined_call_operand.vmem [shape: f32[1,128], index: 2, kind: input, shape index: {}]   ;;  %s8118_s3 = inlined_call_operand.vmem [shape: f32[2,224,128], index: 3, kind: output, shape index: {}]  }
   0x1   :  { %v4459_v0 = vld [vmem:[%s8115_s1 + $0x2] sm:$0x3]  ;;  %v6325_v1 = vld [vmem:[%s8115_s1 + $0x8] sm:$0x3]  ;;  %v4630_v6 = vld [vmem:[%s8116_s0 + $0x19] sm:$0xff] }
   0x2   :  { %v100_v2 = vld [vmem:[%s8116_s0 + $0x1] sm:$0xff]  ;;  %6289 = vmatprep.subr.msk.bf16.mxu1 %vm271_vm0, %v4459_v0  ;;  %6293 = vmatprep.subr.msk.bf16.mxu0 %vm271_vm0, %v6325_v1  ;;  %v273_v3 = vsel %vm271_vm0, %v4459_v0, 0  ;;  %v6336_v4 = vsel %vm271_vm0, %v6325_v1, 0  ;;  %v101_v5 = vld [vmem:[%s8116_s0 + $0x9] sm:$0xff]  ;;  %v4632_v11 = vld [vmem:[%s8116_s0 + $0x31] sm:$0xff] }
   0x3   :  { %v4631_v7 = vld [vmem:[%s8116_s0 + $0x21] sm:$0xff]  ;;  %5318 = vmatpush3.bf16.msra.mxu1 %v273_v3  ;;  %5550 = vmatpush3.bf16.msra.mxu0 %v6336_v4  ;;  %v156_v8 = vpack.c.bf16 %v101_v5, %v100_v2  ;;  %v4633_v12 = vld [vmem:[%s8116_s0 + $0x39] sm:$0xff]  ;;  %v4771_v14 = vld [vmem:[%s8115_s1 + $0xa] sm:$0x3] }
   0x4   :  { %v1905_v9 = vpack.c.bf16 %v4631_v7, %v4630_v6  ;;  %v99_v10 = vld [vmem:[%s8115_s1] sm:$0x3]  ;;  %v1906_v13 = vpack.c.bf16 %v4633_v12, %v4632_v11  ;;  %v4634_v16 = vld [vmem:[%s8116_s0 + $0x49] sm:$0xff]  ;;  %v4635_v17 = vld [vmem:[%s8116_s0 + $0x51] sm:$0xff]  ;;  %v2506_v18 = vsel %vm271_vm0, %v4771_v14, 0  ;;  %6295 = vmatprep.subr.msk.bf16.mxu0 %vm271_vm0, %v4771_v14 }
   0x5   :  { %6290 = vmatprep.subr.msk.bf16.mxu1 %vm271_vm0, %v99_v10  ;;  %v617_v15 = vsel %vm271_vm0, %v99_v10, 0  ;;  %5319 = vmatprep.mubr.msk.bf16.mxu1 %vm186_vm1, %v156_v8  ;;  %v1907_v19 = vpack.c.bf16 %v4635_v17, %v4634_v16  ;;  %v4636_v20 = vld [vmem:[%s8116_s0 + $0x61] sm:$0xff]  ;;  %v4637_v21 = vld [vmem:[%s8116_s0 + $0x69] sm:$0xff]  ;;  %v4638_v22 = vld [vmem:[%s8116_s0 + $0x79] sm:$0xff] }
   0x6   :  { %5551 = vmatprep.mubr.msk.bf16.mxu0 %vm186_vm1, %v1905_v9  ;;  %5320 = vmatmul.mubr.msk.bf16.vlgmr.msra.gmra.mrb[0].mxu1 %vm186_vm1, %v1905_v9  ;;  %v4639_v23 = vld [vmem:[%s8116_s0 + $0x81] sm:$0xff]  ;;  %v1908_v24 = vpack.c.bf16 %v4637_v21, %v4636_v20  ;;  %v4640_v26 = vld [vmem:[%s8116_s0 + $0x91] sm:$0xff]  ;;  %v4641_v27 = vld [vmem:[%s8116_s0 + $0x99] sm:$0xff] }
   0x7   :  { %5552 = vmatmul.mubr.msk.bf16.vlgmr.msra.gmra.mrb[0].mxu0 %vm186_vm1, %v1906_v13  ;;  %5376 = vmatpush3.bf16.msra.mxu1 %v617_v15  ;;  %v1909_v25 = vpack.c.bf16 %v4639_v23, %v4638_v22  ;;  %v6401_v28 = vld [vmem:[%s8115_s1 + $0xc] sm:$0x3]  ;;  %v4643_v30 = vld [vmem:[%s8116_s0 + $0xb1] sm:$0xff]  ;;  %v1910_v31 = vpack.c.bf16 %v4641_v27, %v4640_v26  ;;  %v4644_v33 = vld [vmem:[%s8116_s0 + $0xc1] sm:$0xff] }
   0x8   :  { %5608 = vmatpush3.bf16.msra.mxu0 %v2506_v18  ;;  %5323 = vmatprep.mubr.msk.bf16.mxu1 %vm186_vm1, %v1906_v13  ;;  %v4642_v29 = vld [vmem:[%s8116_s0 + $0xa9] sm:$0xff]  ;;  %v4646_v35 = vld [vmem:[%s8116_s0 + $0xd9] sm:$0xff]  ;;  %v4647_v36 = vld [vmem:[%s8116_s0 + $0xe1] sm:$0xff]  ;;  %v2993_v10 = vsel %vm271_vm0, %v6401_v28, 0 }
   0x9   :  { %5555 = vmatprep.mubr.msk.bf16.mxu0 %vm186_vm1, %v1907_v19  ;;  %6296 = vmatprep.subr.msk.bf16.mxu0 %vm271_vm0, %v6401_v28  ;;  %v1911_v32 = vpack.c.bf16 %v4643_v30, %v4642_v29  ;;  %v4645_v34 = vld [vmem:[%s8116_s0 + $0xc9] sm:$0xff]  ;;  %v1913_v38 = vpack.c.bf16 %v4647_v36, %v4646_v35  ;;  %v4648_v39 = vld [vmem:[%s8116_s0 + $0xf1] sm:$0xff]  ;;  %v4649_v40 = vld [vmem:[%s8116_s0 + $0xf9] sm:$0xff] }
   0xa   :  { %v1912_v37 = vpack.c.bf16 %v4645_v34, %v4644_v33  ;;  %v4650_v41 = vld [vmem:[%s8116_s0 + $0x109] sm:$0xff]  ;;  %v4651_v42 = vld [vmem:[%s8116_s0 + $0x111] sm:$0xff]  ;;  %v6446_v43 = vld [vmem:[%s8115_s1 + $0x4] sm:$0x3]  ;;  %v1914_v44 = vpack.c.bf16 %v4649_v40, %v4648_v39 }
   0xb   :  { %6291 = vmatprep.subr.msk.bf16.mxu1 %vm271_vm0, %v6446_v43  ;;  %v1915_v45 = vpack.c.bf16 %v4651_v42, %v4650_v41  ;;  %v4652_v46 = vld [vmem:[%s8116_s0 + $0x121] sm:$0xff]  ;;  %v4653_v47 = vld [vmem:[%s8116_s0 + $0x129] sm:$0xff]  ;;  %v4654_v48 = vld [vmem:[%s8116_s0 + $0x139] sm:$0xff] }
   0xc   :  { %v4655_v49 = vld [vmem:[%s8116_s0 + $0x141] sm:$0xff]  ;;  %v1916_v50 = vpack.c.bf16 %v4653_v47, %v4652_v46  ;;  %v4656_v52 = vld [vmem:[%s8116_s0 + $0x151] sm:$0xff]  ;;  %v4657_v53 = vld [vmem:[%s8116_s0 + $0x159] sm:$0xff] }
   0xd   :  { %v1917_v51 = vpack.c.bf16 %v4655_v49, %v4654_v48  ;;  %v128_v54 = vld [vmem:[%s8116_s0 + $0x181] sm:$0xff]  ;;  %v129_v55 = vld [vmem:[%s8116_s0 + $0x189] sm:$0xff]  ;;  %v1918_v58 = vpack.c.bf16 %v4657_v53, %v4656_v52  ;;  %v130_v61 = vld [vmem:[%s8116_s0 + $0x199] sm:$0xff] }
   0xe   :  { %5324 = vmatmul.mubr.msk.bf16.gmra.mrb[4].mxu1 %vm186_vm1, %v1907_v19  ;;  %v4715_v56 = vld [vmem:[%s8116_s0 + $0x1a] sm:$0xff]  ;;  %v4716_v57 = vld [vmem:[%s8116_s0 + $0x22] sm:$0xff]  ;;  %v170_v59 = vpack.c.bf16 %v129_v55, %v128_v54  ;;  %v4717_v63 = vld [vmem:[%s8116_s0 + $0x32] sm:$0xff] }
   0xf   :  { %5556 = vmatmul.mubr.msk.bf16.gmra.mrb[4].mxu0 %vm186_vm1, %v1908_v24  ;;  %5327 = vmatprep.mubr.msk.bf16.mxu1 %vm186_vm1, %v1908_v24  ;;  %v6488_v60 = vpack.c.bf16 %v4716_v57, %v4715_v56  ;;  %v131_v62 = vld [vmem:[%s8116_s0 + $0x1a1] sm:$0xff]  ;;  %v132_v2 = vld [vmem:[%s8116_s0 + $0x1b1] sm:$0xff]  ;;  %v133_v3 = vld [vmem:[%s8116_s0 + $0x1b9] sm:$0xff] }
  0x10   :  { %5559 = vmatprep.mubr.msk.bf16.mxu0 %vm186_vm1, %v1909_v25  ;;  %v4718_v0 = vld [vmem:[%s8116_s0 + $0x3a] sm:$0xff]  ;;  %v4719_v5 = vld [vmem:[%s8116_s0 + $0x4a] sm:$0xff]  ;;  %v4720_v6 = vld [vmem:[%s8116_s0 + $0x52] sm:$0xff]  ;;  %v171_v7 = vpack.c.bf16 %v131_v62, %v130_v61  ;;  %v172_v9 = vpack.c.bf16 %v133_v3, %v132_v2 }
  0x11   :  { %v6519_v8 = vpack.c.bf16 %v4718_v0, %v4717_v63  ;;  %v6523_v11 = vpack.c.bf16 %v4720_v6, %v4719_v5  ;;  %v6528_v12 = vld [vmem:[%s8115_s1 + $0xe] sm:$0x3]  ;;  %v135_v14 = vld [vmem:[%s8116_s0 + $0x1d1] sm:$0xff]  ;;  %v4721_v15 = vld [vmem:[%s8116_s0 + $0x62] sm:$0xff] }
  0x12   :  { %v134_v13 = vld [vmem:[%s8116_s0 + $0x1c9] sm:$0xff]  ;;  %v136_v17 = vld [vmem:[%s8116_s0 + $0x1e1] sm:$0xff]  ;;  %v4725_v27 = vld [vmem:[%s8116_s0 + $0x92] sm:$0xff] }
  0x13   :  { %v4722_v16 = vld [vmem:[%s8116_s0 + $0x6a] sm:$0xff]  ;;  %v4723_v19 = vld [vmem:[%s8116_s0 + $0x7a] sm:$0xff]  ;;  %v4724_v20 = vld [vmem:[%s8116_s0 + $0x82] sm:$0xff]  ;;  %v173_v21 = vpack.c.bf16 %v135_v14, %v134_v13 }
  0x14   :  { %v137_v18 = vld [vmem:[%s8116_s0 + $0x1e9] sm:$0xff]  ;;  %v6562_v22 = vpack.c.bf16 %v4722_v16, %v4721_v15  ;;  %v6564_v24 = vpack.c.bf16 %v4724_v20, %v4723_v19  ;;  %v139_v26 = vld [vmem:[%s8116_s0 + $0x201] sm:$0xff]  ;;  %v140_v29 = vld [vmem:[%s8116_s0 + $0x211] sm:$0xff] }
  0x15   :  { %v174_v23 = vpack.c.bf16 %v137_v18, %v136_v17  ;;  %v4726_v28 = vld [vmem:[%s8116_s0 + $0x9a] sm:$0xff]  ;;  %v4729_v39 = vld [vmem:[%s8116_s0 + $0xc2] sm:$0xff]  ;;  %v4730_v40 = vld [vmem:[%s8116_s0 + $0xca] sm:$0xff] }
  0x16   :  { %5328 = vmatmul.mubr.msk.bf16.gmra.mrb[8].mxu1 %vm186_vm1, %v1909_v25  ;;  %v138_v25 = vld [vmem:[%s8116_s0 + $0x1f9] sm:$0xff]  ;;  %v6596_v34 = vpack.c.bf16 %v4726_v28, %v4725_v27  ;;  %v144_v41 = vld [vmem:[%s8116_s0 + $0x241] sm:$0xff]  ;;  %v145_v42 = vld [vmem:[%s8116_s0 + $0x249] sm:$0xff]  ;;  %v6630_v47 = vpack.c.bf16 %v4730_v40, %v4729_v39 }
  0x17   :  { %5560 = vmatmul.mubr.msk.bf16.gmra.mrb[8].mxu0 %vm186_vm1, %v1910_v31  ;;  %5331 = vmatprep.mubr.msk.bf16.mxu1 %vm186_vm1, %v1910_v31  ;;  %v141_v30 = vld [vmem:[%s8116_s0 + $0x219] sm:$0xff]  ;;  %v4727_v31 = vld [vmem:[%s8116_s0 + $0xaa] sm:$0xff]  ;;  %v175_v33 = vpack.c.bf16 %v139_v26, %v138_v25  ;;  %v178_v48 = vpack.c.bf16 %v145_v42, %v144_v41  ;;  %v4737_v2 = vld [vmem:[%s8116_s0 + $0x122] sm:$0xff] }
  0x18   :  { %5563 = vmatprep.mubr.msk.bf16.mxu0 %vm186_vm1, %v1911_v32  ;;  %v176_v35 = vpack.c.bf16 %v141_v30, %v140_v29  ;;  %v4733_v52 = vld [vmem:[%s8116_s0 + $0xf2] sm:$0xff]  ;;  %v4734_v53 = vld [vmem:[%s8116_s0 + $0xfa] sm:$0xff]  ;;  %v4735_v56 = vld [vmem:[%s8116_s0 + $0x10a] sm:$0xff] }
  0x19   :  { %v148_v54 = vld [vmem:[%s8116_s0 + $0x271] sm:$0xff]  ;;  %v149_v55 = vld [vmem:[%s8116_s0 + $0x279] sm:$0xff]  ;;  %v150_v63 = vld [vmem:[%s8116_s0 + $0x289] sm:$0xff] }
  0x1a   :  { %v4736_v57 = vld [vmem:[%s8116_s0 + $0x112] sm:$0xff]  ;;  %v180_v61 = vpack.c.bf16 %v149_v55, %v148_v54  ;;  %v4738_v3 = vld [vmem:[%s8116_s0 + $0x12a] sm:$0xff]  ;;  %v152_v5 = vld [vmem:[%s8116_s0 + $0x2a1] sm:$0xff] }
  0x1b   :  { %v6666_v62 = vpack.c.bf16 %v4736_v57, %v4735_v56  ;;  %v151_v0 = vld [vmem:[%s8116_s0 + $0x291] sm:$0xff]  ;;  %v153_v6 = vld [vmem:[%s8116_s0 + $0x2a9] sm:$0xff]  ;;  %v6698_v13 = vpack.c.bf16 %v4738_v3, %v4737_v2  ;;  %v154_v16 = vld [vmem:[%s8116_s0 + $0x2b9] sm:$0xff] }
  0x1c   :  { %v182_v14 = vpack.c.bf16 %v153_v6, %v152_v5  ;;  %v155_v17 = vld [vmem:[%s8116_s0 + $0x2c1] sm:$0xff]  ;;  %v4741_v18 = vld [vmem:[%s8116_s0 + $0x152] sm:$0xff] }
  0x1d   :  { %v4742_v19 = vld [vmem:[%s8116_s0 + $0x15a] sm:$0xff]  ;;  %v4744_v25 = vld [vmem:[%s8116_s0 + $0x1a2] sm:$0xff]  ;;  %v183_v26 = vpack.c.bf16 %v155_v17, %v154_v16  ;;  %v4748_v39 = vld [vmem:[%s8116_s0 + $0x1d2] sm:$0xff] }
  0x1e   :  { %5332 = vmatmul.mubr.msk.bf16.gmra.mrb[12].mxu1 %vm186_vm1, %v1911_v32  ;;  %v4728_v32 = vld [vmem:[%s8116_s0 + $0xb2] sm:$0xff]  ;;  %v15_v20 = vld [vmem:[%s8116_s0] sm:$0xff]  ;;  %v2404_v27 = vpack.c.bf16 %v4742_v19, %v4741_v18  ;;  %v29_v18 = vld [vmem:[%s8116_s0 + $0xa8] sm:$0xff] }
  0x1f   :  { %5564 = vmatmul.mubr.msk.bf16.gmra.mrb[12].mxu0 %vm186_vm1, %v1912_v37  ;;  %5335 = vmatprep.mubr.msk.bf16.mxu1 %vm186_vm1, %v1912_v37  ;;  %v6598_v36 = vpack.c.bf16 %v4728_v32, %v4727_v31  ;;  %v142_v37 = vld [vmem:[%s8116_s0 + $0x229] sm:$0xff]  ;;  %v17_v30 = vld [vmem:[%s8116_s0 + $0x18] sm:$0xff]  ;;  %v18_v31 = vld [vmem:[%s8116_s0 + $0x20] sm:$0xff] }
  0x20   :  { %5567 = vmatprep.mubr.msk.bf16.mxu0 %vm186_vm1, %v1913_v38  ;;  %v4745_v32 = vld [vmem:[%s8116_s0 + $0x1b2] sm:$0xff]  ;;  %v6763_v40 = vpack.c.bf16 %v18_v31, %v17_v30  ;;  %v4751_v54 = vld [vmem:[%s8116_s0 + $0x1fa] sm:$0xff]  ;;  %v4752_v55 = vld [vmem:[%s8116_s0 + $0x202] sm:$0xff] }
  0x21   :  { %v4753_v2 = vld [vmem:[%s8116_s0 + $0x212] sm:$0xff]  ;;  %v4754_v3 = vld [vmem:[%s8116_s0 + $0x21a] sm:$0xff] }
  0x22   :  { %v27_v5 = vld [vmem:[%s8116_s0 + $0x90] sm:$0xff]  ;;  %v28_v6 = vld [vmem:[%s8116_s0 + $0x98] sm:$0xff] }
  0x23   :  { %v6856_v16 = vpack.c.bf16 %v28_v6, %v27_v5  ;;  %v30_v19 = vld [vmem:[%s8116_s0 + $0xb0] sm:$0xff]  ;;  %v4767_v5 = vld [vmem:[%s8116_s0 + $0x2ba] sm:$0xff]  ;;  %v4768_v6 = vld [vmem:[%s8116_s0 + $0x2c2] sm:$0xff] }
  0x26   :  { %5336 = vmatmul.mubr.msk.bf16.gmra.mrb[16].mxu1 %vm186_vm1, %v1913_v38  ;;  %v143_v38 = vld [vmem:[%s8116_s0 + $0x231] sm:$0xff] }
  0x27   :  { %5568 = vmatmul.mubr.msk.bf16.gmra.mrb[16].mxu0 %vm186_vm1, %v1914_v44  ;;  %5339 = vmatprep.mubr.msk.bf16.mxu1 %vm186_vm1, %v1914_v44  ;;  %v4731_v44 = vld [vmem:[%s8116_s0 + $0xda] sm:$0xff]  ;;  %v177_v46 = vpack.c.bf16 %v143_v38, %v142_v37  ;;  %v4747_v38 = vld [vmem:[%s8116_s0 + $0x1ca] sm:$0xff] }
  0x28   :  { %5571 = vmatprep.mubr.msk.bf16.mxu0 %vm186_vm1, %v1915_v45  ;;  %v20_v37 = vld [vmem:[%s8116_s0 + $0x38] sm:$0xff] }
  0x2e   :  { %5340 = vmatmul.mubr.msk.bf16.gmra.mrb[20].mxu1 %vm186_vm1, %v1915_v45  ;;  %v4732_v45 = vld [vmem:[%s8116_s0 + $0xe2] sm:$0xff] }
  0x2f   :  { %5572 = vmatmul.mubr.msk.bf16.gmra.mrb[20].mxu0 %vm186_vm1, %v1916_v50  ;;  %5343 = vmatprep.mubr.msk.bf16.mxu1 %vm186_vm1, %v1916_v50  ;;  %v6632_v49 = vpack.c.bf16 %v4732_v45, %v4731_v44  ;;  %v146_v50 = vld [vmem:[%s8116_s0 + $0x259] sm:$0xff]  ;;  %v1047_v44 = vsel %vm271_vm0, %v6446_v43, 0  ;;  %v6771_v45 = vpack.c.bf16 %v4748_v39, %v4747_v38  ;;  %v22_v43 = vld [vmem:[%s8116_s0 + $0x50] sm:$0xff] }
  0x30   :  { %5575 = vmatprep.mubr.msk.bf16.mxu0 %vm186_vm1, %v1917_v51  ;;  %v4762_v38 = vld [vmem:[%s8116_s0 + $0x27a] sm:$0xff]  ;;  %v35_v39 = vld [vmem:[%s8116_s0 + $0xf0] sm:$0xff] }
  0x36   :  { %5344 = vmatmul.mubr.msk.bf16.gmra.mrb[24].mxu1 %vm186_vm1, %v1917_v51  ;;  %v147_v51 = vld [vmem:[%s8116_s0 + $0x261] sm:$0xff] }
  0x37   :  { %5576 = vmatmul.mubr.msk.bf16.gmra.mrb[24].mxu0 %vm186_vm1, %v1918_v58  ;;  %5347 = vmatprep.mubr.msk.bf16.mxu1 %vm186_vm1, %v170_v59  ;;  %v179_v58 = vpack.c.bf16 %v147_v51, %v146_v50  ;;  %v6664_v59 = vpack.c.bf16 %v4734_v53, %v4733_v52  ;;  %v4749_v50 = vld [vmem:[%s8116_s0 + $0x1e2] sm:$0xff]  ;;  %v4750_v51 = vld [vmem:[%s8116_s0 + $0x1ea] sm:$0xff] }
  0x38   :  { %5609 = vmatprep.mubr.msk.bf16.mxu0 %vm186_vm1, %v6488_v60  ;;  %v23_v52 = vld [vmem:[%s8116_s0 + $0x60] sm:$0xff]  ;;  %v24_v53 = vld [vmem:[%s8116_s0 + $0x68] sm:$0xff]  ;;  %v6814_v57 = vpack.c.bf16 %v4750_v51, %v4749_v50 }
  0x3e   :  { %5348 = vmatmul.mubr.msk.bf16.gmra.mrb[28].mxu1 %vm186_vm1, %v171_v7  ;;  %v4739_v7 = vld [vmem:[%s8116_s0 + $0x13a] sm:$0xff] }
  0x3f   :  { %5610 = vmatmul.mubr.msk.bf16.vlgmr.msra.gmra.mrb[0].mxu0 %vm186_vm1, %v6519_v8  ;;  %5351 = vmatprep.mubr.msk.bf16.mxu1 %vm186_vm1, %v172_v9  ;;  %v4740_v9 = vld [vmem:[%s8116_s0 + $0x142] sm:$0xff] }
  0x40   :  { %5666 = vmatpush3.bf16.msra.mxu0 %v2993_v10  ;;  %5613 = vmatprep.mubr.msk.bf16.mxu0 %vm186_vm1, %v6523_v11  ;;  %v181_v10 = vpack.c.bf16 %v151_v0, %v150_v63  ;;  %v6700_v15 = vpack.c.bf16 %v4740_v9, %v4739_v7  ;;  %v25_v63 = vld [vmem:[%s8116_s0 + $0x78] sm:$0xff]  ;;  %v26_v0 = vld [vmem:[%s8116_s0 + $0x80] sm:$0xff]  ;;  %v4755_v7 = vld [vmem:[%s8116_s0 + $0x22a] sm:$0xff] }
  0x41   :  { %6297 = vmatprep.subr.msk.bf16.mxu0 %vm271_vm0, %v6528_v12  ;;  %v4756_v9 = vld [vmem:[%s8116_s0 + $0x232] sm:$0xff] }
  0x42   :  { %v6858_v17 = vpack.c.bf16 %v4756_v9, %v4755_v7 }
  0x46   :  { %5352 = vmatmul.mubr.msk.bf16.gmra.mrb[32].mxu1 %vm186_vm1, %v173_v21  ;;  %v16_v21 = vld [vmem:[%s8116_s0 + $0x8] sm:$0xff] }
  0x47   :  { %5614 = vmatmul.mubr.msk.bf16.gmra.mrb[4].mxu0 %vm186_vm1, %v6562_v22  ;;  %5355 = vmatprep.mubr.msk.bf16.mxu1 %vm186_vm1, %v174_v23  ;;  %v4743_v23 = vld [vmem:[%s8116_s0 + $0x19a] sm:$0xff]  ;;  %v71_v28 = vpack.c.bf16 %v16_v21, %v15_v20  ;;  %v4757_v20 = vld [vmem:[%s8116_s0 + $0x242] sm:$0xff]  ;;  %v4758_v21 = vld [vmem:[%s8116_s0 + $0x24a] sm:$0xff] }
  0x48   :  { %5617 = vmatprep.mubr.msk.bf16.mxu0 %vm186_vm1, %v6564_v24  ;;  %v6732_v29 = vpack.c.bf16 %v4744_v25, %v4743_v23  ;;  %v31_v23 = vld [vmem:[%s8116_s0 + $0xc0] sm:$0xff]  ;;  %v32_v25 = vld [vmem:[%s8116_s0 + $0xc8] sm:$0xff]  ;;  %v6894_v30 = vpack.c.bf16 %v4758_v21, %v4757_v20  ;;  %v41_v20 = vld [vmem:[%s8116_s0 + $0x138] sm:$0xff] }
  0x49   :  { %v6896_v31 = vpack.c.bf16 %v32_v25, %v31_v23  ;;  %v42_v21 = vld [vmem:[%s8116_s0 + $0x140] sm:$0xff]  ;;  %v4769_v23 = vld [vmem:[%s8116_s0 + $0x2d2] sm:$0xff] }
  0x4a   :  { %v4770_v25 = vld [vmem:[%s8116_s0 + $0x2da] sm:$0xff] }
  0x4e   :  { %5356 = vmatmul.mubr.msk.bf16.gmra.mrb[36].mxu1 %vm186_vm1, %v175_v33  ;;  %v4746_v33 = vld [vmem:[%s8116_s0 + $0x1ba] sm:$0xff] }
  0x4f   :  { %5618 = vmatmul.mubr.msk.bf16.gmra.mrb[8].mxu0 %vm186_vm1, %v6596_v34  ;;  %5359 = vmatprep.mubr.msk.bf16.mxu1 %vm186_vm1, %v176_v35  ;;  %v19_v35 = vld [vmem:[%s8116_s0 + $0x30] sm:$0xff]  ;;  %v6765_v41 = vpack.c.bf16 %v4746_v33, %v4745_v32  ;;  %v33_v33 = vld [vmem:[%s8116_s0 + $0xd8] sm:$0xff] }
  0x50   :  { %5621 = vmatprep.mubr.msk.bf16.mxu0 %vm186_vm1, %v6598_v36  ;;  %v6767_v42 = vpack.c.bf16 %v20_v37, %v19_v35  ;;  %v34_v35 = vld [vmem:[%s8116_s0 + $0xe0] sm:$0xff]  ;;  %v4761_v37 = vld [vmem:[%s8116_s0 + $0x272] sm:$0xff] }
  0x51   :  { %v6932_v50 = vpack.c.bf16 %v34_v35, %v33_v33  ;;  %v6934_v51 = vpack.c.bf16 %v4762_v38, %v4761_v37  ;;  %v7006_v33 = vpack.c.bf16 %v42_v21, %v41_v20  ;;  %v2418_v35 = vpack.c.bf16 %v4770_v25, %v4769_v23  ;;  %v45_v38 = vld [vmem:[%s8116_s0 + $0x198] sm:$0xff]  ;;  %v54_v21 = vld [vmem:[%s8116_s0 + $0x200] sm:$0xff]  ;;  %v55_v23 = vld [vmem:[%s8116_s0 + $0x210] sm:$0xff] }
  0x52   :  { %v53_v20 = vld [vmem:[%s8116_s0 + $0x1f8] sm:$0xff] }
  0x53   :  { %v56_v25 = vld [vmem:[%s8116_s0 + $0x218] sm:$0xff] }
  0x56   :  { %5360 = vmatmul.mubr.msk.bf16.gmra.mrb[40].mxu1 %vm186_vm1, %v177_v46  ;;  %v6776_v46 = vld [vmem:[%s8115_s1 + $0x6] sm:$0x3] }
  0x57   :  { %5622 = vmatmul.mubr.msk.bf16.gmra.mrb[12].mxu0 %vm186_vm1, %v6630_v47  ;;  %5363 = vmatprep.mubr.msk.bf16.mxu1 %vm186_vm1, %v178_v48  ;;  %v21_v48 = vld [vmem:[%s8116_s0 + $0x48] sm:$0xff] }
  0x58   :  { %5625 = vmatprep.mubr.msk.bf16.mxu0 %vm186_vm1, %v6632_v49  ;;  %v6812_v56 = vpack.c.bf16 %v22_v43, %v21_v48  ;;  %v4763_v48 = vld [vmem:[%s8116_s0 + $0x28a] sm:$0xff]  ;;  %v4764_v43 = vld [vmem:[%s8116_s0 + $0x292] sm:$0xff] }
  0x5e   :  { %5364 = vmatmul.mubr.msk.bf16.gmra.mrb[44].mxu1 %vm186_vm1, %v179_v58  ;;  %v6816_v58 = vpack.c.bf16 %v24_v53, %v23_v52  ;;  %v6938_v53 = vpack.c.bf16 %v4764_v43, %v4763_v48  ;;  %v48_v48 = vld [vmem:[%s8116_s0 + $0x1b8] sm:$0xff] }
  0x5f   :  { %5626 = vmatmul.mubr.msk.bf16.gmra.mrb[16].mxu0 %vm186_vm1, %v6664_v59  ;;  %5367 = vmatprep.mubr.msk.bf16.mxu1 %vm186_vm1, %v180_v61  ;;  %v6818_v61 = vpack.c.bf16 %v4752_v55, %v4751_v54  ;;  %v37_v54 = vld [vmem:[%s8116_s0 + $0x108] sm:$0xff]  ;;  %v38_v55 = vld [vmem:[%s8116_s0 + $0x110] sm:$0xff] }
  0x60   :  { %5629 = vmatprep.mubr.msk.bf16.mxu0 %vm186_vm1, %v6666_v62  ;;  %v6972_v7 = vpack.c.bf16 %v38_v55, %v37_v54  ;;  %v3479_v55 = vsel %vm271_vm0, %v6528_v12, 0  ;;  %v50_v12 = vld [vmem:[%s8116_s0 + $0x1d0] sm:$0xff] }
  0x66   :  { %5368 = vmatmul.mubr.msk.bf16.gmra.mrb[48].mxu1 %vm186_vm1, %v181_v10  ;;  %v6852_v10 = vpack.c.bf16 %v26_v0, %v25_v63  ;;  %v4765_v63 = vld [vmem:[%s8116_s0 + $0x2a2] sm:$0xff]  ;;  %v4766_v0 = vld [vmem:[%s8116_s0 + $0x2aa] sm:$0xff] }
  0x67   :  { %5630 = vmatmul.mubr.msk.bf16.gmra.mrb[20].mxu0 %vm186_vm1, %v6698_v13  ;;  %5371 = vmatprep.mubr.msk.bf16.mxu1 %vm186_vm1, %v182_v14  ;;  %v6854_v14 = vpack.c.bf16 %v4754_v3, %v4753_v2  ;;  %v39_v2 = vld [vmem:[%s8116_s0 + $0x120] sm:$0xff]  ;;  %v40_v3 = vld [vmem:[%s8116_s0 + $0x128] sm:$0xff]  ;;  %v6974_v9 = vpack.c.bf16 %v4766_v0, %v4765_v63  ;;  %v7035_v63 = vld [vmem:[%s8115_s1 + $0x10] sm:$0x3] }
  0x68   :  { %5633 = vmatprep.mubr.msk.bf16.mxu0 %vm186_vm1, %v6700_v15  ;;  %v49_v0 = vld [vmem:[%s8116_s0 + $0x1c8] sm:$0xff] }
  0x6e   :  { %5372 = vmatmul.mubr.msk.bf16.gmra.mrb[52].mxu1 %vm186_vm1, %v183_v26  ;;  %v4759_v26 = vld [vmem:[%s8116_s0 + $0x25a] sm:$0xff] }
  0x6f   :  { %5634 = vmatmul.mubr.msk.bf16.gmra.mrb[24].mxu0 %vm186_vm1, %v2404_v27  ;;  %5377 = vmatprep.mubr.msk.bf16.mxu1 %vm186_vm1, %v71_v28  ;;  %v4760_v27 = vld [vmem:[%s8116_s0 + $0x262] sm:$0xff]  ;;  %v6892_v28 = vpack.c.bf16 %v30_v19, %v29_v18  ;;  %v6976_v18 = vpack.c.bf16 %v40_v3, %v39_v2  ;;  %v6978_v19 = vpack.c.bf16 %v4768_v6, %v4767_v5 }
  0x70   :  { %5637 = vmatprep.mubr.msk.bf16.mxu0 %vm186_vm1, %v6732_v29  ;;  %v6898_v32 = vpack.c.bf16 %v4760_v27, %v4759_v26  ;;  %v43_v26 = vld [vmem:[%s8116_s0 + $0x180] sm:$0xff]  ;;  %v44_v27 = vld [vmem:[%s8116_s0 + $0x188] sm:$0xff]  ;;  %v7059_v5 = vpack.c.bf16 %v50_v12, %v49_v0  ;;  %v63_v12 = vld [vmem:[%s8116_s0 + $0x270] sm:$0xff] }
  0x71   :  { %v85_v37 = vpack.c.bf16 %v44_v27, %v43_v26  ;;  %v51_v2 = vld [vmem:[%s8116_s0 + $0x1e0] sm:$0xff]  ;;  %v52_v3 = vld [vmem:[%s8116_s0 + $0x1e8] sm:$0xff]  ;;  %v7083_v26 = vpack.c.bf16 %v54_v21, %v53_v20  ;;  %v7085_v27 = vpack.c.bf16 %v56_v25, %v55_v23  ;;  %v66_v23 = vld [vmem:[%s8116_s0 + $0x290] sm:$0xff] }
  0x72   :  { %v7061_v6 = vpack.c.bf16 %v52_v3, %v51_v2  ;;  %v62_v0 = vld [vmem:[%s8116_s0 + $0x260] sm:$0xff]  ;;  %v64_v2 = vld [vmem:[%s8116_s0 + $0x278] sm:$0xff]  ;;  %v65_v21 = vld [vmem:[%s8116_s0 + $0x288] sm:$0xff] }
  0x73   :  { %v7133_v20 = vpack.c.bf16 %v64_v2, %v63_v12  ;;  %v67_v25 = vld [vmem:[%s8116_s0 + $0x2a0] sm:$0xff]  ;;  %v69_v12 = vld [vmem:[%s8116_s0 + $0x2b8] sm:$0xff] }
  0x74   :  { %v70_v2 = vld [vmem:[%s8116_s0 + $0x2c0] sm:$0xff] }
  0x76   :  { %5378 = vmatmul.mubr.msk.bf16.vlgmr.msra.gmra.mrb[0].mxu1 %vm186_vm1, %v6763_v40 }
  0x77   :  { %5638 = vmatmul.mubr.msk.bf16.gmra.mrb[28].mxu0 %vm186_vm1, %v6765_v41  ;;  %5434 = vmatpush3.bf16.msra.mxu1 %v1047_v44  ;;  %v36_v44 = vld [vmem:[%s8116_s0 + $0xf8] sm:$0xff] }
  0x78   :  { %5381 = vmatprep.mubr.msk.bf16.mxu1 %vm186_vm1, %v6767_v42  ;;  %5641 = vmatprep.mubr.msk.bf16.mxu0 %vm186_vm1, %v6771_v45  ;;  %v6936_v52 = vpack.c.bf16 %v36_v44, %v35_v39  ;;  %v46_v39 = vld [vmem:[%s8116_s0 + $0x1a0] sm:$0xff]  ;;  %v47_v44 = vld [vmem:[%s8116_s0 + $0x1b0] sm:$0xff] }
  0x79   :  { %6292 = vmatprep.subr.msk.bf16.mxu1 %vm271_vm0, %v6776_v46  ;;  %v7026_v43 = vpack.c.bf16 %v46_v39, %v45_v38  ;;  %v7028_v54 = vpack.c.bf16 %v48_v48, %v47_v44  ;;  %v59_v38 = vld [vmem:[%s8116_s0 + $0x240] sm:$0xff]  ;;  %v60_v39 = vld [vmem:[%s8116_s0 + $0x248] sm:$0xff] }
  0x7a   :  { %v7109_v48 = vpack.c.bf16 %v60_v39, %v59_v38  ;;  %v4825_v38 = vld [vmem:[%s8116_s0 + $0x158] sm:$0xff]  ;;  %v7161_v39 = vpack.c.bf16 %v66_v23, %v65_v21  ;;  %v4826_v21 = vld [vmem:[%s8116_s0 + $0x168] sm:$0xff]  ;;  %v4827_v23 = vld [vmem:[%s8116_s0 + $0x170] sm:$0xff] }
  0x7b   :  { %8121 = vst [vmem:[#allocation2_spill] sm:$0xff] %v7026_v43 }
  0x7e   :  { %5382 = vmatmul.mubr.msk.bf16.gmra.mrb[4].mxu1 %vm186_vm1, %v6812_v56 }
  0x7f   :  { %5642 = vmatmul.mubr.msk.bf16.gmra.mrb[32].mxu0 %vm186_vm1, %v6814_v57  ;;  %5385 = vmatprep.mubr.msk.bf16.mxu1 %vm186_vm1, %v6816_v58 }
  0x80   :  { %5645 = vmatprep.mubr.msk.bf16.mxu0 %vm186_vm1, %v6818_v61 }
  0x86   :  { %5386 = vmatmul.mubr.msk.bf16.gmra.mrb[8].mxu1 %vm186_vm1, %v6852_v10 }
  0x87   :  { %5646 = vmatmul.mubr.msk.bf16.gmra.mrb[36].mxu0 %vm186_vm1, %v6854_v14  ;;  %5389 = vmatprep.mubr.msk.bf16.mxu1 %vm186_vm1, %v6856_v16 }
  0x88   :  { %5649 = vmatprep.mubr.msk.bf16.mxu0 %vm186_vm1, %v6858_v17 }
  0x8e   :  { %5390 = vmatmul.mubr.msk.bf16.gmra.mrb[12].mxu1 %vm186_vm1, %v6892_v28 }
  0x8f   :  { %5650 = vmatmul.mubr.msk.bf16.gmra.mrb[40].mxu0 %vm186_vm1, %v6894_v30  ;;  %5393 = vmatprep.mubr.msk.bf16.mxu1 %vm186_vm1, %v6896_v31 }
  0x90   :  { %5653 = vmatprep.mubr.msk.bf16.mxu0 %vm186_vm1, %v6898_v32 }
  0x96   :  { %5394 = vmatmul.mubr.msk.bf16.gmra.mrb[16].mxu1 %vm186_vm1, %v6932_v50 }
  0x97   :  { %5654 = vmatmul.mubr.msk.bf16.gmra.mrb[44].mxu0 %vm186_vm1, %v6934_v51  ;;  %5397 = vmatprep.mubr.msk.bf16.mxu1 %vm186_vm1, %v6936_v52 }
  0x98   :  { %5657 = vmatprep.mubr.msk.bf16.mxu0 %vm186_vm1, %v6938_v53 }
  0x9e   :  { %5398 = vmatmul.mubr.msk.bf16.gmra.mrb[20].mxu1 %vm186_vm1, %v6972_v7 }
  0x9f   :  { %5658 = vmatmul.mubr.msk.bf16.gmra.mrb[48].mxu0 %vm186_vm1, %v6974_v9  ;;  %5401 = vmatprep.mubr.msk.bf16.mxu1 %vm186_vm1, %v6976_v18 }
  0xa0   :  { %5661 = vmatprep.mubr.msk.bf16.mxu0 %vm186_vm1, %v6978_v19 }
  0xa6   :  { %5402 = vmatmul.mubr.msk.bf16.gmra.mrb[24].mxu1 %vm186_vm1, %v7006_v33 }
  0xa7   :  { %5662 = vmatmul.mubr.msk.bf16.gmra.mrb[52].mxu0 %vm186_vm1, %v2418_v35  ;;  %5405 = vmatprep.mubr.msk.bf16.mxu1 %vm186_vm1, %v85_v37  ;;  %v57_v35 = vld [vmem:[%s8116_s0 + $0x228] sm:$0xff]  ;;  %v58_v37 = vld [vmem:[%s8116_s0 + $0x230] sm:$0xff] }
  0xa8   :  { %5667 = vmatprep.mubr.msk.bf16.mxu0 %vm186_vm1, %v6767_v42  ;;  %v7107_v44 = vpack.c.bf16 %v58_v37, %v57_v35  ;;  %v68_v35 = vld [vmem:[%s8116_s0 + $0x2a8] sm:$0xff]  ;;  %v4824_v37 = vld [vmem:[%s8116_s0 + $0x150] sm:$0xff] }
  0xae   :  { %5406 = vmatmul.mubr.msk.bf16.gmra.mrb[28].mxu1 %vm186_vm1, %v7026_v43 }
  0xaf   :  { %5668 = vmatmul.mubr.msk.bf16.vlgmr.msra.gmra.mrb[0].mxu0 %vm186_vm1, %v6812_v56  ;;  %5409 = vmatprep.mubr.msk.bf16.mxu1 %vm186_vm1, %v7028_v54 }
  0xb0   :  { %5724 = vmatpush3.bf16.msra.mxu0 %v3479_v55  ;;  %5671 = vmatprep.mubr.msk.bf16.mxu0 %vm186_vm1, %v6816_v58  ;;  %v61_v55 = vld [vmem:[%s8116_s0 + $0x258] sm:$0xff] }
  0xb1   :  { %6298 = vmatprep.subr.msk.bf16.mxu0 %vm271_vm0, %v7035_v63  ;;  %v7131_v3 = vpack.c.bf16 %v62_v0, %v61_v55  ;;  %v7163_v55 = vpack.c.bf16 %v68_v35, %v67_v25  ;;  %v7165_v0 = vpack.c.bf16 %v4825_v38, %v4824_v37  ;;  %v876_v25 = vld [vmem:[%s8116_s0 + $0x2] sm:$0xff]  ;;  %v877_v35 = vld [vmem:[%s8116_s0 + $0xa] sm:$0xff]  ;;  %v7193_v37 = vpack.c.bf16 %v70_v2, %v69_v12 }
  0xb2   :  { %v2891_v38 = vpack.c.bf16 %v4827_v23, %v4826_v21  ;;  %v932_v43 = vpack.c.bf16 %v877_v35, %v876_v25  ;;  %v3965_v12 = vsel %vm271_vm0, %v7035_v63, 0  ;;  %v4891_v21 = vld [vmem:[%s8116_s0 + $0x79] sm:$0xff]  ;;  %v4892_v23 = vld [vmem:[%s8116_s0 + $0x81] sm:$0xff]  ;;  %v4895_v35 = vld [vmem:[%s8116_s0 + $0xa9] sm:$0xff] }
  0xb3   :  { %8122 = vst [vmem:[#allocation3_spill] sm:$0xff] %v7165_v0  ;;  %v4894_v63 = vld [vmem:[%s8116_s0 + $0x99] sm:$0xff]  ;;  %v3367_v25 = vpack.c.bf16 %v4892_v23, %v4891_v21  ;;  %v4915_v21 = vld [vmem:[%s8116_s0 + $0x1c9] sm:$0xff]  ;;  %v4916_v23 = vld [vmem:[%s8116_s0 + $0x1d1] sm:$0xff] }
  0xb6   :  { %5410 = vmatmul.mubr.msk.bf16.gmra.mrb[32].mxu1 %vm186_vm1, %v7059_v5 }
  0xb7   :  { %5672 = vmatmul.mubr.msk.bf16.gmra.mrb[4].mxu0 %vm186_vm1, %v6852_v10  ;;  %5413 = vmatprep.mubr.msk.bf16.mxu1 %vm186_vm1, %v7061_v6 }
  0xb8   :  { %5675 = vmatprep.mubr.msk.bf16.mxu0 %vm186_vm1, %v6856_v16 }
  0xbe   :  { %5414 = vmatmul.mubr.msk.bf16.gmra.mrb[36].mxu1 %vm186_vm1, %v7083_v26 }
  0xbf   :  { %5676 = vmatmul.mubr.msk.bf16.gmra.mrb[8].mxu0 %vm186_vm1, %v6892_v28  ;;  %5417 = vmatprep.mubr.msk.bf16.mxu1 %vm186_vm1, %v7085_v27 }
  0xc0   :  { %5679 = vmatprep.mubr.msk.bf16.mxu0 %vm186_vm1, %v6896_v31 }
  0xc6   :  { %5418 = vmatmul.mubr.msk.bf16.gmra.mrb[40].mxu1 %vm186_vm1, %v7107_v44 }
  0xc7   :  { %5680 = vmatmul.mubr.msk.bf16.gmra.mrb[12].mxu0 %vm186_vm1, %v6932_v50  ;;  %5421 = vmatprep.mubr.msk.bf16.mxu1 %vm186_vm1, %v7109_v48 }
  0xc8   :  { %5683 = vmatprep.mubr.msk.bf16.mxu0 %vm186_vm1, %v6936_v52 }
  0xce   :  { %5422 = vmatmul.mubr.msk.bf16.gmra.mrb[44].mxu1 %vm186_vm1, %v7131_v3 }
  0xcf   :  { %5684 = vmatmul.mubr.msk.bf16.gmra.mrb[16].mxu0 %vm186_vm1, %v6972_v7  ;;  %5425 = vmatprep.mubr.msk.bf16.mxu1 %vm186_vm1, %v7133_v20 }
  0xd0   :  { %5687 = vmatprep.mubr.msk.bf16.mxu0 %vm186_vm1, %v6976_v18 }
  0xd6   :  { %5426 = vmatmul.mubr.msk.bf16.gmra.mrb[48].mxu1 %vm186_vm1, %v7161_v39 }
  0xd7   :  { %5688 = vmatmul.mubr.msk.bf16.gmra.mrb[20].mxu0 %vm186_vm1, %v7006_v33  ;;  %5429 = vmatprep.mubr.msk.bf16.mxu1 %vm186_vm1, %v7163_v55 }
  0xd8   :  { %5691 = vmatprep.mubr.msk.bf16.mxu0 %vm186_vm1, %v7165_v0  ;;  %v1534_v0 = vsel %vm271_vm0, %v6776_v46, 0  ;;  %v4888_v46 = vld [vmem:[%s8116_s0 + $0x51] sm:$0xff] }
  0xde   :  { %5430 = vmatmul.mubr.msk.bf16.gmra.mrb[52].mxu1 %vm186_vm1, %v7193_v37 }
  0xdf   :  { %5692 = vmatmul.mubr.msk.bf16.gmra.mrb[24].mxu0 %vm186_vm1, %v2891_v38  ;;  %5435 = vmatprep.mubr.msk.bf16.mxu1 %vm186_vm1, %v932_v43  ;;  %v4889_v43 = vld [vmem:[%s8116_s0 + $0x61] sm:$0xff]  ;;  %v4896_v38 = vld [vmem:[%s8116_s0 + $0xb1] sm:$0xff] }
  0xe0   :  { %5695 = vmatprep.mubr.msk.bf16.mxu0 %vm186_vm1, %v7028_v54 }
  0xe6   :  { %5436 = vmatmul.mubr.msk.bf16.vlgmr.msra.gmra.mrb[0].mxu1 %vm186_vm1, %v6488_v60  ;;  %v4853_v60 = vld [vmem:[%s8116_s0 + $0x2d8] sm:$0xff] }
  0xe7   :  { %5696 = vmatmul.mubr.msk.bf16.gmra.mrb[28].mxu0 %vm186_vm1, %v7059_v5  ;;  %5492 = vmatpush3.bf16.msra.mxu1 %v1534_v0 }
  0xe8   :  { %5439 = vmatprep.mubr.msk.bf16.mxu1 %vm186_vm1, %v6519_v8  ;;  %5699 = vmatprep.mubr.msk.bf16.mxu0 %vm186_vm1, %v7061_v6 }
  0xe9   :  { %6294 = vmatprep.subr.msk.bf16.mxu1 %vm271_vm0, %v6325_v1  ;;  %v4852_v1 = vld [vmem:[%s8116_s0 + $0x2d0] sm:$0xff] }
  0xea   :  { %v7251_v8 = vpack.c.bf16 %v4853_v60, %v4852_v1  ;;  %v4897_v1 = vld [vmem:[%s8116_s0 + $0xc1] sm:$0xff]  ;;  %v3369_v60 = vpack.c.bf16 %v4896_v38, %v4895_v35  ;;  %v4923_v38 = vld [vmem:[%s8116_s0 + $0x229] sm:$0xff] }
  0xee   :  { %5440 = vmatmul.mubr.msk.bf16.gmra.mrb[4].mxu1 %vm186_vm1, %v6523_v11  ;;  %v4854_v11 = vld [vmem:[%s8116_s0 + $0x2e8] sm:$0xff] }
  0xef   :  { %5700 = vmatmul.mubr.msk.bf16.gmra.mrb[32].mxu0 %vm186_vm1, %v7083_v26  ;;  %5443 = vmatprep.mubr.msk.bf16.mxu1 %vm186_vm1, %v6562_v22  ;;  %v4855_v22 = vld [vmem:[%s8116_s0 + $0x2f0] sm:$0xff] }
  0xf0   :  { %5703 = vmatprep.mubr.msk.bf16.mxu0 %vm186_vm1, %v7085_v27 }
  0xf6   :  { %5444 = vmatmul.mubr.msk.bf16.gmra.mrb[8].mxu1 %vm186_vm1, %v6564_v24  ;;  %v904_v24 = vld [vmem:[%s8116_s0 + $0x182] sm:$0xff] }
  0xf7   :  { %5704 = vmatmul.mubr.msk.bf16.gmra.mrb[36].mxu0 %vm186_vm1, %v7107_v44  ;;  %5447 = vmatprep.mubr.msk.bf16.mxu1 %vm186_vm1, %v6596_v34  ;;  %v905_v34 = vld [vmem:[%s8116_s0 + $0x18a] sm:$0xff] }
  0xf8   :  { %5707 = vmatprep.mubr.msk.bf16.mxu0 %vm186_vm1, %v7109_v48 }
  0xfe   :  { %5448 = vmatmul.mubr.msk.bf16.gmra.mrb[12].mxu1 %vm186_vm1, %v6598_v36  ;;  %v4885_v36 = vld [vmem:[%s8116_s0 + $0x31] sm:$0xff] }
  0xff   :  { %5708 = vmatmul.mubr.msk.bf16.gmra.mrb[40].mxu0 %vm186_vm1, %v7131_v3  ;;  %5451 = vmatprep.mubr.msk.bf16.mxu1 %vm186_vm1, %v6630_v47  ;;  %v4886_v47 = vld [vmem:[%s8116_s0 + $0x39] sm:$0xff] }
 0x100   :  { %5711 = vmatprep.mubr.msk.bf16.mxu0 %vm186_vm1, %v7133_v20 }
 0x106   :  { %5452 = vmatmul.mubr.msk.bf16.gmra.mrb[16].mxu1 %vm186_vm1, %v6632_v49  ;;  %v2905_v49 = vpack.c.bf16 %v4855_v22, %v4854_v11  ;;  %v4899_v11 = vld [vmem:[%s8116_s0 + $0xd9] sm:$0xff]  ;;  %v4900_v22 = vld [vmem:[%s8116_s0 + $0xe1] sm:$0xff] }
 0x107   :  { %5712 = vmatmul.mubr.msk.bf16.gmra.mrb[44].mxu0 %vm186_vm1, %v7161_v39  ;;  %5455 = vmatprep.mubr.msk.bf16.mxu1 %vm186_vm1, %v6664_v59  ;;  %v946_v59 = vpack.c.bf16 %v905_v34, %v904_v24  ;;  %v4901_v24 = vld [vmem:[%s8116_s0 + $0xf1] sm:$0xff]  ;;  %v3371_v34 = vpack.c.bf16 %v4900_v22, %v4899_v11  ;;  %v4928_v11 = vld [vmem:[%s8116_s0 + $0x261] sm:$0xff]  ;;  %v4930_v22 = vld [vmem:[%s8116_s0 + $0x279] sm:$0xff] }
 0x108   :  { %5715 = vmatprep.mubr.msk.bf16.mxu0 %vm186_vm1, %v7163_v55 }
 0x10e   :  { %5456 = vmatmul.mubr.msk.bf16.gmra.mrb[20].mxu1 %vm186_vm1, %v6666_v62  ;;  %v3364_v62 = vpack.c.bf16 %v4886_v47, %v4885_v36  ;;  %v4903_v36 = vld [vmem:[%s8116_s0 + $0x109] sm:$0xff]  ;;  %v4904_v47 = vld [vmem:[%s8116_s0 + $0x111] sm:$0xff] }
 0x10f   :  { %5716 = vmatmul.mubr.msk.bf16.gmra.mrb[48].mxu0 %vm186_vm1, %v7193_v37  ;;  %5459 = vmatprep.mubr.msk.bf16.mxu1 %vm186_vm1, %v6698_v13  ;;  %v4887_v13 = vld [vmem:[%s8116_s0 + $0x49] sm:$0xff] }
 0x110   :  { %5719 = vmatprep.mubr.msk.bf16.mxu0 %vm186_vm1, %v7251_v8  ;;  %v3365_v0 = vpack.c.bf16 %v4888_v46, %v4887_v13  ;;  %v4908_v13 = vld [vmem:[%s8116_s0 + $0x141] sm:$0xff]  ;;  %v4909_v46 = vld [vmem:[%s8116_s0 + $0x151] sm:$0xff] }
 0x116   :  { %5460 = vmatmul.mubr.msk.bf16.gmra.mrb[24].mxu1 %vm186_vm1, %v6700_v15  ;;  %v4890_v15 = vld [vmem:[%s8116_s0 + $0x69] sm:$0xff] }
 0x117   :  { %5720 = vmatmul.mubr.msk.bf16.gmra.mrb[52].mxu0 %vm186_vm1, %v2905_v49  ;;  %5463 = vmatprep.mubr.msk.bf16.mxu1 %vm186_vm1, %v946_v59  ;;  %v3366_v2 = vpack.c.bf16 %v4890_v15, %v4889_v43  ;;  %v4905_v49 = vld [vmem:[%s8116_s0 + $0x121] sm:$0xff]  ;;  %v3373_v59 = vpack.c.bf16 %v4904_v47, %v4903_v36  ;;  %v4911_v15 = vld [vmem:[%s8116_s0 + $0x169] sm:$0xff]  ;;  %v4935_v47 = vld [vmem:[%s8116_s0 + $0x2b9] sm:$0xff] }
 0x118   :  { %5725 = vmatprep.mubr.msk.bf16.mxu0 %vm186_vm1, %v3364_v62  ;;  %v4907_v62 = vld [vmem:[%s8116_s0 + $0x139] sm:$0xff] }
 0x119   :  { %v3375_v43 = vpack.c.bf16 %v4908_v13, %v4907_v62  ;;  %v4940_v62 = vld [vmem:[%s8116_s0 + $0x2f1] sm:$0xff]  ;;  %v4971_v13 = vld [vmem:[%s8116_s0 + $0x3a] sm:$0xff] }
 0x11e   :  { %5464 = vmatmul.mubr.msk.bf16.gmra.mrb[28].mxu1 %vm186_vm1, %v6732_v29  ;;  %v4893_v29 = vld [vmem:[%s8116_s0 + $0x91] sm:$0xff] }
 0x11f   :  { %5726 = vmatmul.mubr.msk.bf16.vlgmr.msra.gmra.mrb[0].mxu0 %vm186_vm1, %v3365_v0  ;;  %5467 = vmatprep.mubr.msk.bf16.mxu1 %vm186_vm1, %v6765_v41  ;;  %v3368_v41 = vpack.c.bf16 %v4894_v63, %v4893_v29  ;;  %v4912_v0 = vld [vmem:[%s8116_s0 + $0x171] sm:$0xff]  ;;  %v4918_v29 = vld [vmem:[%s8116_s0 + $0x1e9] sm:$0xff] }
 0x120   :  { %5782 = vmatpush3.bf16.msra.mxu0 %v3965_v12  ;;  %5729 = vmatprep.mubr.msk.bf16.mxu0 %vm186_vm1, %v3366_v2  ;;  %v4913_v12 = vld [vmem:[%s8116_s0 + $0x1b1] sm:$0xff]  ;;  %v3377_v2 = vpack.c.bf16 %v4912_v0, %v4911_v15  ;;  %v4974_v0 = vld [vmem:[%s8116_s0 + $0x62] sm:$0xff] }
 0x121   :  { %v4973_v15 = vld [vmem:[%s8116_s0 + $0x52] sm:$0xff] }
 0x126   :  { %5468 = vmatmul.mubr.msk.bf16.gmra.mrb[32].mxu1 %vm186_vm1, %v6771_v45  ;;  %v4898_v45 = vld [vmem:[%s8116_s0 + $0xc9] sm:$0xff] }
 0x127   :  { %5730 = vmatmul.mubr.msk.bf16.gmra.mrb[4].mxu0 %vm186_vm1, %v3367_v25  ;;  %5471 = vmatprep.mubr.msk.bf16.mxu1 %vm186_vm1, %v6814_v57  ;;  %v3370_v57 = vpack.c.bf16 %v4898_v45, %v4897_v1  ;;  %v4919_v25 = vld [vmem:[%s8116_s0 + $0x1f9] sm:$0xff]  ;;  %v4924_v1 = vld [vmem:[%s8116_s0 + $0x231] sm:$0xff]  ;;  %v4926_v45 = vld [vmem:[%s8116_s0 + $0x249] sm:$0xff] }
 0x128   :  { %5733 = vmatprep.mubr.msk.bf16.mxu0 %vm186_vm1, %v3368_v41  ;;  %v4920_v41 = vld [vmem:[%s8116_s0 + $0x201] sm:$0xff] }
 0x12e   :  { %5472 = vmatmul.mubr.msk.bf16.gmra.mrb[36].mxu1 %vm186_vm1, %v6818_v61  ;;  %v4902_v61 = vld [vmem:[%s8116_s0 + $0xf9] sm:$0xff] }
 0x12f   :  { %5734 = vmatmul.mubr.msk.bf16.gmra.mrb[8].mxu0 %vm186_vm1, %v3369_v60  ;;  %5475 = vmatprep.mubr.msk.bf16.mxu1 %vm186_vm1, %v6854_v14  ;;  %v3372_v14 = vpack.c.bf16 %v4902_v61, %v4901_v24  ;;  %v4931_v61 = vld [vmem:[%s8116_s0 + $0x289] sm:$0xff] }
 0x130   :  { %5737 = vmatprep.mubr.msk.bf16.mxu0 %vm186_vm1, %v3370_v57  ;;  %v4927_v57 = vld [vmem:[%s8116_s0 + $0x259] sm:$0xff] }
 0x136   :  { %5476 = vmatmul.mubr.msk.bf16.gmra.mrb[40].mxu1 %vm186_vm1, %v6858_v17  ;;  %v4906_v17 = vld [vmem:[%s8116_s0 + $0x129] sm:$0xff] }
 0x137   :  { %5738 = vmatmul.mubr.msk.bf16.gmra.mrb[12].mxu0 %vm186_vm1, %v3371_v34  ;;  %5479 = vmatprep.mubr.msk.bf16.mxu1 %vm186_vm1, %v6894_v30  ;;  %v3374_v30 = vpack.c.bf16 %v4906_v17, %v4905_v49  ;;  %v4932_v34 = vld [vmem:[%s8116_s0 + $0x291] sm:$0xff]  ;;  %v4936_v49 = vld [vmem:[%s8116_s0 + $0x2c1] sm:$0xff]  ;;  %v4938_v17 = vld [vmem:[%s8116_s0 + $0x2d9] sm:$0xff] }
 0x138   :  { %5741 = vmatprep.mubr.msk.bf16.mxu0 %vm186_vm1, %v3372_v14  ;;  %v4934_v14 = vld [vmem:[%s8116_s0 + $0x2a9] sm:$0xff] }
 0x13e   :  { %5480 = vmatmul.mubr.msk.bf16.gmra.mrb[44].mxu1 %vm186_vm1, %v6898_v32  ;;  %v4910_v32 = vld [vmem:[%s8116_s0 + $0x159] sm:$0xff] }
 0x13f   :  { %5742 = vmatmul.mubr.msk.bf16.gmra.mrb[16].mxu0 %vm186_vm1, %v3373_v59  ;;  %5483 = vmatprep.mubr.msk.bf16.mxu1 %vm186_vm1, %v6934_v51  ;;  %v3376_v51 = vpack.c.bf16 %v4910_v32, %v4909_v46  ;;  %v8123_v32 = vld [vmem:[#allocation3_spill] sm:$0xff] }
 0x140   :  { %5745 = vmatprep.mubr.msk.bf16.mxu0 %vm186_vm1, %v3374_v30  ;;  %v4939_v30 = vld [vmem:[%s8116_s0 + $0x2e9] sm:$0xff] }
 0x146   :  { %5484 = vmatmul.mubr.msk.bf16.gmra.mrb[48].mxu1 %vm186_vm1, %v6938_v53  ;;  %v4914_v53 = vld [vmem:[%s8116_s0 + $0x1b9] sm:$0xff] }
 0x147   :  { %5746 = vmatmul.mubr.msk.bf16.gmra.mrb[20].mxu0 %vm186_vm1, %v3375_v43  ;;  %5487 = vmatprep.mubr.msk.bf16.mxu1 %vm186_vm1, %v6974_v9  ;;  %v7406_v9 = vpack.c.bf16 %v4914_v53, %v4913_v12  ;;  %v8124_v43 = vld [vmem:[#allocation2_spill] sm:$0xff]  ;;  %v4975_v12 = vld [vmem:[%s8116_s0 + $0x6a] sm:$0xff] }
 0x148   :  { %5749 = vmatprep.mubr.msk.bf16.mxu0 %vm186_vm1, %v3376_v51  ;;  %v4972_v51 = vld [vmem:[%s8116_s0 + $0x4a] sm:$0xff] }
 0x149   :  { %v3851_v53 = vpack.c.bf16 %v4973_v15, %v4972_v51  ;;  %v5004_v51 = vld [vmem:[%s8116_s0 + $0x1fa] sm:$0xff]  ;;  %v5005_v15 = vld [vmem:[%s8116_s0 + $0x202] sm:$0xff] }
 0x14e   :  { %5488 = vmatmul.mubr.msk.bf16.gmra.mrb[52].mxu1 %vm186_vm1, %v6978_v19  ;;  %v4917_v19 = vld [vmem:[%s8116_s0 + $0x1e1] sm:$0xff] }
 0x14f   :  { %5750 = vmatmul.mubr.msk.bf16.gmra.mrb[24].mxu0 %vm186_vm1, %v3377_v2  ;;  %5493 = vmatprep.mubr.msk.bf16.mxu1 %vm186_vm1, %v6763_v40  ;;  %v7427_v40 = vpack.c.bf16 %v4916_v23, %v4915_v21  ;;  %v7429_v63 = vpack.c.bf16 %v4918_v29, %v4917_v19  ;;  %v3852_v2 = vpack.c.bf16 %v4975_v12, %v4974_v0  ;;  %v4976_v21 = vld [vmem:[%s8116_s0 + $0x7a] sm:$0xff]  ;;  %v4977_v23 = vld [vmem:[%s8116_s0 + $0x82] sm:$0xff]  ;;  %v4978_v19 = vld [vmem:[%s8116_s0 + $0x92] sm:$0xff] }
 0x150   :  { %5753 = vmatprep.mubr.msk.bf16.mxu0 %vm186_vm1, %v7406_v9  ;;  %v3853_v29 = vpack.c.bf16 %v4977_v23, %v4976_v21  ;;  %v5006_v0 = vld [vmem:[%s8116_s0 + $0x212] sm:$0xff]  ;;  %v3867_v12 = vpack.c.bf16 %v5005_v15, %v5004_v51  ;;  %v5010_v21 = vld [vmem:[%s8116_s0 + $0x242] sm:$0xff] }
 0x156   :  { %5494 = vmatmul.mubr.msk.bf16.vlgmr.msra.gmra.mrb[0].mxu1 %vm186_vm1, %v6767_v42  ;;  %v4921_v42 = vld [vmem:[%s8116_s0 + $0x211] sm:$0xff] }
 0x157   :  { %5754 = vmatmul.mubr.msk.bf16.gmra.mrb[28].mxu0 %vm186_vm1, %v7427_v40  ;;  %5840 = vmatpush3.bf16.msra.mxu1 %v6336_v4  ;;  %v4922_v4 = vld [vmem:[%s8116_s0 + $0x219] sm:$0xff] }
 0x158   :  { %5497 = vmatprep.mubr.msk.bf16.mxu1 %vm186_vm1, %v6812_v56  ;;  %5757 = vmatprep.mubr.msk.bf16.mxu0 %vm186_vm1, %v7429_v63  ;;  %v7452_v56 = vpack.c.bf16 %v4920_v41, %v4919_v25  ;;  %v7454_v35 = vpack.c.bf16 %v4922_v4, %v4921_v42  ;;  %v4980_v25 = vld [vmem:[%s8116_s0 + $0xaa] sm:$0xff]  ;;  %v4981_v41 = vld [vmem:[%s8116_s0 + $0xb2] sm:$0xff]  ;;  %v4982_v42 = vld [vmem:[%s8116_s0 + $0xc2] sm:$0xff] }
 0x159   :  { %v3855_v4 = vpack.c.bf16 %v4981_v41, %v4980_v25  ;;  %v5016_v25 = vld [vmem:[%s8116_s0 + $0x28a] sm:$0xff]  ;;  %v5017_v41 = vld [vmem:[%s8116_s0 + $0x292] sm:$0xff] }
 0x15e   :  { %5498 = vmatmul.mubr.msk.bf16.gmra.mrb[4].mxu1 %vm186_vm1, %v6816_v58  ;;  %v4925_v58 = vld [vmem:[%s8116_s0 + $0x241] sm:$0xff] }
 0x15f   :  { %5758 = vmatmul.mubr.msk.bf16.gmra.mrb[32].mxu0 %vm186_vm1, %v7452_v56  ;;  %5501 = vmatprep.mubr.msk.bf16.mxu1 %vm186_vm1, %v6852_v10  ;;  %v7476_v10 = vpack.c.bf16 %v4924_v1, %v4923_v38  ;;  %v7478_v60 = vpack.c.bf16 %v4926_v45, %v4925_v58  ;;  %v4984_v38 = vld [vmem:[%s8116_s0 + $0xda] sm:$0xff]  ;;  %v4985_v1 = vld [vmem:[%s8116_s0 + $0xe2] sm:$0xff]  ;;  %v4986_v58 = vld [vmem:[%s8116_s0 + $0xf2] sm:$0xff] }
 0x160   :  { %5761 = vmatprep.mubr.msk.bf16.mxu0 %vm186_vm1, %v7454_v35  ;;  %v3857_v45 = vpack.c.bf16 %v4985_v1, %v4984_v38  ;;  %v5022_v38 = vld [vmem:[%s8116_s0 + $0x2d2] sm:$0xff] }
 0x166   :  { %5502 = vmatmul.mubr.msk.bf16.gmra.mrb[8].mxu1 %vm186_vm1, %v6856_v16  ;;  %v4929_v16 = vld [vmem:[%s8116_s0 + $0x271] sm:$0xff] }
 0x167   :  { %5762 = vmatmul.mubr.msk.bf16.gmra.mrb[36].mxu0 %vm186_vm1, %v7476_v10  ;;  %5505 = vmatprep.mubr.msk.bf16.mxu1 %vm186_vm1, %v6892_v28  ;;  %v7500_v28 = vpack.c.bf16 %v4928_v11, %v4927_v57  ;;  %v7502_v24 = vpack.c.bf16 %v4930_v22, %v4929_v16  ;;  %v4988_v57 = vld [vmem:[%s8116_s0 + $0x10a] sm:$0xff]  ;;  %v4989_v11 = vld [vmem:[%s8116_s0 + $0x112] sm:$0xff]  ;;  %v4990_v16 = vld [vmem:[%s8116_s0 + $0x122] sm:$0xff] }
 0x168   :  { %5765 = vmatprep.mubr.msk.bf16.mxu0 %vm186_vm1, %v7478_v60  ;;  %v3859_v22 = vpack.c.bf16 %v4989_v11, %v4988_v57 }
 0x16e   :  { %5506 = vmatmul.mubr.msk.bf16.gmra.mrb[12].mxu1 %vm186_vm1, %v6896_v31  ;;  %v4933_v31 = vld [vmem:[%s8116_s0 + $0x2a1] sm:$0xff] }
 0x16f   :  { %5766 = vmatmul.mubr.msk.bf16.gmra.mrb[40].mxu0 %vm186_vm1, %v7500_v28  ;;  %5509 = vmatprep.mubr.msk.bf16.mxu1 %vm186_vm1, %v6932_v50  ;;  %v7524_v50 = vpack.c.bf16 %v4932_v34, %v4931_v61  ;;  %v7526_v36 = vpack.c.bf16 %v4934_v14, %v4933_v31  ;;  %v4992_v61 = vld [vmem:[%s8116_s0 + $0x13a] sm:$0xff]  ;;  %v4993_v34 = vld [vmem:[%s8116_s0 + $0x142] sm:$0xff]  ;;  %v4994_v31 = vld [vmem:[%s8116_s0 + $0x152] sm:$0xff] }
 0x170   :  { %5769 = vmatprep.mubr.msk.bf16.mxu0 %vm186_vm1, %v7502_v24  ;;  %v3861_v14 = vpack.c.bf16 %v4993_v34, %v4992_v61 }
 0x176   :  { %5510 = vmatmul.mubr.msk.bf16.gmra.mrb[16].mxu1 %vm186_vm1, %v6936_v52  ;;  %v4937_v52 = vld [vmem:[%s8116_s0 + $0x2d1] sm:$0xff] }
 0x177   :  { %5770 = vmatmul.mubr.msk.bf16.gmra.mrb[44].mxu0 %vm186_vm1, %v7524_v50  ;;  %5513 = vmatprep.mubr.msk.bf16.mxu1 %vm186_vm1, %v6972_v7  ;;  %v7548_v7 = vpack.c.bf16 %v4936_v49, %v4935_v47  ;;  %v7550_v59 = vpack.c.bf16 %v4938_v17, %v4937_v52  ;;  %v4996_v47 = vld [vmem:[%s8116_s0 + $0x16a] sm:$0xff]  ;;  %v4997_v49 = vld [vmem:[%s8116_s0 + $0x172] sm:$0xff]  ;;  %v4999_v17 = vld [vmem:[%s8116_s0 + $0x1ba] sm:$0xff] }
 0x178   :  { %5773 = vmatprep.mubr.msk.bf16.mxu0 %vm186_vm1, %v7526_v36  ;;  %v4658_v52 = vld [vmem:[%s8116_s0 + $0x199] sm:$0xff] }
 0x17e   :  { %5514 = vmatmul.mubr.msk.bf16.gmra.mrb[20].mxu1 %vm186_vm1, %v6976_v18  ;;  %v4970_v18 = vld [vmem:[%s8116_s0 + $0x32] sm:$0xff] }
 0x17f   :  { %5774 = vmatmul.mubr.msk.bf16.gmra.mrb[48].mxu0 %vm186_vm1, %v7548_v7  ;;  %5517 = vmatprep.mubr.msk.bf16.mxu1 %vm186_vm1, %v7006_v33  ;;  %v3391_v33 = vpack.c.bf16 %v4940_v62, %v4939_v30  ;;  %v3850_v46 = vpack.c.bf16 %v4971_v13, %v4970_v18  ;;  %v3863_v30 = vpack.c.bf16 %v4997_v49, %v4996_v47  ;;  %v5000_v13 = vld [vmem:[%s8116_s0 + $0x1ca] sm:$0xff] }
 0x180   :  { %5777 = vmatprep.mubr.msk.bf16.mxu0 %vm186_vm1, %v7550_v59 }
 0x186   :  { %5518 = vmatmul.mubr.msk.bf16.gmra.mrb[24].mxu1 %vm186_vm1, %v8123_v32 }
 0x187   :  { %5778 = vmatmul.mubr.msk.bf16.gmra.mrb[52].mxu0 %vm186_vm1, %v3391_v33  ;;  %5521 = vmatprep.mubr.msk.bf16.mxu1 %vm186_vm1, %v8124_v43  ;;  %v5001_v33 = vld [vmem:[%s8116_s0 + $0x1d2] sm:$0xff] }
 0x188   :  { %5783 = vmatprep.mubr.msk.bf16.mxu0 %vm186_vm1, %v3850_v46  ;;  %v5002_v46 = vld [vmem:[%s8116_s0 + $0x1e2] sm:$0xff]  ;;  %v3865_v32 = vpack.c.bf16 %v5001_v33, %v5000_v13 }
 0x18e   :  { %5522 = vmatmul.mubr.msk.bf16.gmra.mrb[28].mxu1 %vm186_vm1, %v7028_v54  ;;  %v4979_v54 = vld [vmem:[%s8116_s0 + $0x9a] sm:$0xff] }
 0x18f   :  { %5784 = vmatmul.mubr.msk.bf16.vlgmr.msra.gmra.mrb[0].mxu0 %vm186_vm1, %v3851_v53  ;;  %5525 = vmatprep.mubr.msk.bf16.mxu1 %vm186_vm1, %v7059_v5  ;;  %v3854_v5 = vpack.c.bf16 %v4979_v54, %v4978_v19  ;;  %v5008_v53 = vld [vmem:[%s8116_s0 + $0x22a] sm:$0xff]  ;;  %v5012_v19 = vld [vmem:[%s8116_s0 + $0x25a] sm:$0xff]  ;;  %v5013_v54 = vld [vmem:[%s8116_s0 + $0x262] sm:$0xff] }
 0x190   :  { %5787 = vmatprep.mubr.msk.bf16.mxu0 %vm186_vm1, %v3852_v2  ;;  %v5009_v2 = vld [vmem:[%s8116_s0 + $0x232] sm:$0xff] }
 0x191   :  { %v3869_v23 = vpack.c.bf16 %v5009_v2, %v5008_v53 }
 0x196   :  { %5526 = vmatmul.mubr.msk.bf16.gmra.mrb[32].mxu1 %vm186_vm1, %v7061_v6  ;;  %v4983_v6 = vld [vmem:[%s8116_s0 + $0xca] sm:$0xff] }
 0x197   :  { %5788 = vmatmul.mubr.msk.bf16.gmra.mrb[4].mxu0 %vm186_vm1, %v3853_v29  ;;  %5529 = vmatprep.mubr.msk.bf16.mxu1 %vm186_vm1, %v7083_v26  ;;  %v3856_v26 = vpack.c.bf16 %v4983_v6, %v4982_v42  ;;  %v5014_v29 = vld [vmem:[%s8116_s0 + $0x272] sm:$0xff]  ;;  %v5018_v42 = vld [vmem:[%s8116_s0 + $0x2a2] sm:$0xff]  ;;  %v3873_v6 = vpack.c.bf16 %v5017_v41, %v5016_v25 }
 0x198   :  { %5791 = vmatprep.mubr.msk.bf16.mxu0 %vm186_vm1, %v3854_v5  ;;  %v3871_v5 = vpack.c.bf16 %v5013_v54, %v5012_v19 }
 0x19e   :  { %5530 = vmatmul.mubr.msk.bf16.gmra.mrb[36].mxu1 %vm186_vm1, %v7085_v27  ;;  %v4987_v27 = vld [vmem:[%s8116_s0 + $0xfa] sm:$0xff] }
 0x19f   :  { %5792 = vmatmul.mubr.msk.bf16.gmra.mrb[8].mxu0 %vm186_vm1, %v3855_v4  ;;  %5533 = vmatprep.mubr.msk.bf16.mxu1 %vm186_vm1, %v7107_v44  ;;  %v3858_v44 = vpack.c.bf16 %v4987_v27, %v4986_v58  ;;  %v5020_v4 = vld [vmem:[%s8116_s0 + $0x2ba] sm:$0xff]  ;;  %v5024_v58 = vld [vmem:[%s8116_s0 + $0x2ea] sm:$0xff]  ;;  %v5025_v27 = vld [vmem:[%s8116_s0 + $0x2f2] sm:$0xff] }
 0x1a0   :  { %5795 = vmatprep.mubr.msk.bf16.mxu0 %vm186_vm1, %v3856_v26  ;;  %v5021_v26 = vld [vmem:[%s8116_s0 + $0x2c2] sm:$0xff] }
 0x1a1   :  { %v3875_v1 = vpack.c.bf16 %v5021_v26, %v5020_v4 }
 0x1a6   :  { %5534 = vmatmul.mubr.msk.bf16.gmra.mrb[40].mxu1 %vm186_vm1, %v7109_v48  ;;  %v4991_v48 = vld [vmem:[%s8116_s0 + $0x12a] sm:$0xff] }
 0x1a7   :  { %5796 = vmatmul.mubr.msk.bf16.gmra.mrb[12].mxu0 %vm186_vm1, %v3857_v45  ;;  %5537 = vmatprep.mubr.msk.bf16.mxu1 %vm186_vm1, %v7131_v3  ;;  %v3860_v3 = vpack.c.bf16 %v4991_v48, %v4990_v16  ;;  %v3877_v45 = vpack.c.bf16 %v5025_v27, %v5024_v58 }
 0x1a8   :  { %5799 = vmatprep.mubr.msk.bf16.mxu0 %vm186_vm1, %v3858_v44 }
 0x1ae   :  { %5538 = vmatmul.mubr.msk.bf16.gmra.mrb[44].mxu1 %vm186_vm1, %v7133_v20  ;;  %v4995_v20 = vld [vmem:[%s8116_s0 + $0x15a] sm:$0xff] }
 0x1af   :  { %5800 = vmatmul.mubr.msk.bf16.gmra.mrb[16].mxu0 %vm186_vm1, %v3859_v22  ;;  %5541 = vmatprep.mubr.msk.bf16.mxu1 %vm186_vm1, %v7161_v39  ;;  %v3862_v39 = vpack.c.bf16 %v4995_v20, %v4994_v31 }
 0x1b0   :  { %5803 = vmatprep.mubr.msk.bf16.mxu0 %vm186_vm1, %v3860_v3 }
 0x1b6   :  { %5542 = vmatmul.mubr.msk.bf16.gmra.mrb[48].mxu1 %vm186_vm1, %v7163_v55  ;;  %v4659_v55 = vld [vmem:[%s8116_s0 + $0x1a1] sm:$0xff] }
 0x1b7   :  { %5804 = vmatmul.mubr.msk.bf16.gmra.mrb[20].mxu0 %vm186_vm1, %v3861_v14  ;;  %5545 = vmatprep.mubr.msk.bf16.mxu1 %vm186_vm1, %v7193_v37  ;;  %v4998_v37 = vld [vmem:[%s8116_s0 + $0x1b2] sm:$0xff]  ;;  %v1919_v62 = vpack.c.bf16 %v4659_v55, %v4658_v52 }
 0x1b8   :  { %5807 = vmatprep.mubr.msk.bf16.mxu0 %vm186_vm1, %v3862_v39  ;;  %v3864_v18 = vpack.c.bf16 %v4999_v17, %v4998_v37 }
 0x1be   :  { %5546 = vmatmul.mubr.msk.bf16.gmra.mrb[52].mxu1 %vm186_vm1, %v7251_v8  ;;  %v5003_v8 = vld [vmem:[%s8116_s0 + $0x1ea] sm:$0xff] }
 0x1bf   :  { %5808 = vmatmul.mubr.msk.bf16.gmra.mrb[24].mxu0 %vm186_vm1, %v3863_v30  ;;  %5579 = vmatprep.mubr.msk.bf16.mxu1 %vm186_vm1, %v1919_v62  ;;  %v3866_v43 = vpack.c.bf16 %v5003_v8, %v5002_v46 }
 0x1c0   :  { %5811 = vmatprep.mubr.msk.bf16.mxu0 %vm186_vm1, %v3864_v18 }
 0x1c6   :  { %5580 = vmatmul.mubr.msk.bf16.vlgmr.msra.gmra.mrb[28].mxu1 %vm186_vm1, %v7406_v9  ;;  %v5007_v9 = vld [vmem:[%s8116_s0 + $0x21a] sm:$0xff] }
 0x1c7   :  { %5812 = vmatmul.mubr.msk.bf16.gmra.mrb[28].mxu0 %vm186_vm1, %v3865_v32  ;;  %5583 = vmatprep.mubr.msk.bf16.mxu1 %vm186_vm1, %v7427_v40  ;;  %v3868_v40 = vpack.c.bf16 %v5007_v9, %v5006_v0  ;;  %v7869_v32 = vld [vmem:[%s8117_s2] ss:$0 sm:$0xff] }
 0x1c8   :  { %5815 = vmatprep.mubr.msk.bf16.mxu0 %vm186_vm1, %v3866_v43 }
 0x1ce   :  { %5584 = vmatmul.mubr.msk.bf16.gmra.mrb[32].mxu1 %vm186_vm1, %v7429_v63  ;;  %v5011_v63 = vld [vmem:[%s8116_s0 + $0x24a] sm:$0xff] }
 0x1cf   :  { %5816 = vmatmul.mubr.msk.bf16.gmra.mrb[32].mxu0 %vm186_vm1, %v3867_v12  ;;  %5587 = vmatprep.mubr.msk.bf16.mxu1 %vm186_vm1, %v7452_v56  ;;  %v3870_v56 = vpack.c.bf16 %v5011_v63, %v5010_v21 }
 0x1d0   :  { %5819 = vmatprep.mubr.msk.bf16.mxu0 %vm186_vm1, %v3868_v40 }
 0x1d6   :  { %5588 = vmatmul.mubr.msk.bf16.gmra.mrb[36].mxu1 %vm186_vm1, %v7454_v35  ;;  %v5015_v35 = vld [vmem:[%s8116_s0 + $0x27a] sm:$0xff] }
 0x1d7   :  { %5820 = vmatmul.mubr.msk.bf16.gmra.mrb[36].mxu0 %vm186_vm1, %v3869_v23  ;;  %5591 = vmatprep.mubr.msk.bf16.mxu1 %vm186_vm1, %v7476_v10  ;;  %v3872_v10 = vpack.c.bf16 %v5015_v35, %v5014_v29 }
 0x1d8   :  { %5823 = vmatprep.mubr.msk.bf16.mxu0 %vm186_vm1, %v3870_v56 }
 0x1de   :  { %5592 = vmatmul.mubr.msk.bf16.gmra.mrb[40].mxu1 %vm186_vm1, %v7478_v60  ;;  %v5019_v60 = vld [vmem:[%s8116_s0 + $0x2aa] sm:$0xff] }
 0x1df   :  { %5824 = vmatmul.mubr.msk.bf16.gmra.mrb[40].mxu0 %vm186_vm1, %v3871_v5  ;;  %5595 = vmatprep.mubr.msk.bf16.mxu1 %vm186_vm1, %v7500_v28  ;;  %v3874_v28 = vpack.c.bf16 %v5019_v60, %v5018_v42 }
 0x1e0   :  { %5827 = vmatprep.mubr.msk.bf16.mxu0 %vm186_vm1, %v3872_v10 }
 0x1e6   :  { %5596 = vmatmul.mubr.msk.bf16.gmra.mrb[44].mxu1 %vm186_vm1, %v7502_v24  ;;  %v5023_v24 = vld [vmem:[%s8116_s0 + $0x2da] sm:$0xff] }
 0x1e7   :  { %5828 = vmatmul.mubr.msk.bf16.gmra.mrb[44].mxu0 %vm186_vm1, %v3873_v6  ;;  %5599 = vmatprep.mubr.msk.bf16.mxu1 %vm186_vm1, %v7524_v50  ;;  %v3876_v50 = vpack.c.bf16 %v5023_v24, %v5022_v38 }
 0x1e8   :  { %5831 = vmatprep.mubr.msk.bf16.mxu0 %vm186_vm1, %v3874_v28 }
 0x1ee   :  { %5600 = vmatmul.mubr.msk.bf16.gmra.mrb[48].mxu1 %vm186_vm1, %v7526_v36 }
 0x1ef   :  { %5832 = vmatmul.mubr.msk.bf16.gmra.mrb[48].mxu0 %vm186_vm1, %v3875_v1  ;;  %5603 = vmatprep.mubr.msk.bf16.mxu1 %vm186_vm1, %v7548_v7 }
 0x1f0   :  { %5835 = vmatprep.mubr.msk.bf16.mxu0 %vm186_vm1, %v3876_v50 }
 0x1f6   :  { %5604 = vmatmul.mubr.msk.bf16.gmra.mrb[52].mxu1 %vm186_vm1, %v7550_v59 }
 0x1f7   :  { %5836 = vmatmul.mubr.msk.bf16.gmra.mrb[52].mxu0 %vm186_vm1, %v3877_v45 }
 0x229   :  { %v5495_v36 = vpop.f32.mrb[0].mxu1 }
 0x22a   :  { %v1570_v44 = vpop.f32.mrb[1].mxu1 }
 0x22b   :  { %v5496_v57 = vpop.f32.mrb[2].mxu1 }
 0x22c   :  { %v1573_v7 = vpop.f32.mrb[3].mxu1 }
 0x231   :  { %v5499_v11 = vpop.f32.mrb[4].mxu1 }
 0x232   :  { %v1586_v16 = vpop.f32.mrb[5].mxu1 }
 0x233   :  { %v5500_v48 = vpop.f32.mrb[6].mxu1 }
 0x234   :  { %v1589_v22 = vpop.f32.mrb[7].mxu1 }
 0x239   :  { %v7826_v3 = vpop.f32.mrb[8].mxu1 }
 0x23a   :  { %v7828_v61 = vpop.f32.mrb[9].mxu1 }
 0x23b   :  { %v7830_v34 = vpop.f32.mrb[10].mxu1 }
 0x23c   :  { %v7832_v31 = vpop.f32.mrb[11].mxu1 }
 0x241   :  { %v7834_v20 = vpop.f32.mrb[12].mxu1 }
 0x242   :  { %v7836_v59 = vpop.f32.mrb[13].mxu1 }
 0x243   :  { %v7838_v14 = vpop.f32.mrb[14].mxu1 }
 0x244   :  { %v7840_v39 = vpop.f32.mrb[15].mxu1 }
 0x249   :  { %v7842_v47 = vpop.f32.mrb[16].mxu1 }
 0x24a   :  { %v7844_v49 = vpop.f32.mrb[17].mxu1 }
 0x24b   :  { %v7846_v52 = vpop.f32.mrb[18].mxu1 }
 0x24c   :  { %v7848_v55 = vpop.f32.mrb[19].mxu1 }
 0x251   :  { %v7850_v37 = vpop.f32.mrb[20].mxu1 }
 0x252   :  { %v7852_v17 = vpop.f32.mrb[21].mxu1 }
 0x253   :  { %v7854_v30 = vpop.f32.mrb[22].mxu1 }
 0x254   :  { %v7856_v62 = vpop.f32.mrb[23].mxu1 }
 0x259   :  { %v7858_v18 = vpop.f32.mrb[24].mxu1 }
 0x25a   :  { %v7860_v13 = vpop.f32.mrb[25].mxu1 }
 0x25b   :  { %v7862_v33 = vpop.f32.mrb[26].mxu1 }
 0x25c   :  { %v7864_v46 = vpop.f32.mrb[27].mxu1 }
 0x262   :  { %v5785_v8 = vpop.f32.mrb[0].mxu0 }
 0x263   :  { %v5841_v43 = vadd.f32 %v5785_v8, %v5495_v36  ;;  %v4001_v51 = vpop.f32.mrb[1].mxu0 }
 0x264   :  { %v5842_v15 = vadd.f32 %v4001_v51, %v1570_v44  ;;  %v5786_v0 = vpop.f32.mrb[2].mxu0 }
 0x265   :  { %v4289_v9 = vadd.f32 %v5841_v43, %v7869_v32  ;;  %v5843_v12 = vadd.f32 %v5786_v0, %v5496_v57  ;;  %v4004_v40 = vpop.f32.mrb[3].mxu0 }
 0x266   :  { %v4287_v53 = vadd.f32 %v5842_v15, %v7869_v32  ;;  %v5844_v2 = vadd.f32 %v4004_v40, %v1573_v7 }
 0x267   :  { %v4345_v21 = vmax.f32 %v4289_v9, 0.0  ;;  %v4290_v63 = vadd.f32 %v5843_v12, %v7869_v32 }
 0x268   :  { %v4343_v23 = vmax.f32 %v4287_v53, 0.0  ;;  %v4288_v56 = vadd.f32 %v5844_v2, %v7869_v32 }
 0x269   :  { %4401 = vst [vmem:[%s8118_s3 + $0x10] sm:$0xff] %v4345_v21  ;;  %v4346_v19 = vmax.f32 %v4290_v63, 0.0 }
 0x26a   :  { %4399 = vst [vmem:[%s8118_s3] sm:$0xff] %v4343_v23  ;;  %v4344_v54 = vmax.f32 %v4288_v56, 0.0  ;;  %v5789_v29 = vpop.f32.mrb[4].mxu0 }
 0x26b   :  { %4402 = vst [vmem:[%s8118_s3 + $0x18] sm:$0xff] %v4346_v19  ;;  %v5845_v35 = vadd.f32 %v5789_v29, %v5499_v11  ;;  %v4017_v5 = vpop.f32.mrb[5].mxu0 }
 0x26c   :  { %4400 = vst [vmem:[%s8118_s3 + $0x8] sm:$0xff] %v4344_v54  ;;  %v5846_v10 = vadd.f32 %v4017_v5, %v1586_v16  ;;  %v5790_v25 = vpop.f32.mrb[6].mxu0 }
 0x26d   :  { %v4293_v41 = vadd.f32 %v5845_v35, %v7869_v32  ;;  %v5847_v42 = vadd.f32 %v5790_v25, %v5500_v48  ;;  %v4020_v60 = vpop.f32.mrb[7].mxu0 }
 0x26e   :  { %v4291_v6 = vadd.f32 %v5846_v10, %v7869_v32  ;;  %v5848_v28 = vadd.f32 %v4020_v60, %v1589_v22 }
 0x26f   :  { %v4349_v4 = vmax.f32 %v4293_v41, 0.0  ;;  %v4294_v26 = vadd.f32 %v5847_v42, %v7869_v32 }
 0x270   :  { %v4347_v38 = vmax.f32 %v4291_v6, 0.0  ;;  %v4292_v24 = vadd.f32 %v5848_v28, %v7869_v32 }
 0x271   :  { %4405 = vst [vmem:[%s8118_s3 + $0x30] sm:$0xff] %v4349_v4  ;;  %v4350_v1 = vmax.f32 %v4294_v26, 0.0 }
 0x272   :  { %4403 = vst [vmem:[%s8118_s3 + $0x20] sm:$0xff] %v4347_v38  ;;  %v4348_v50 = vmax.f32 %v4292_v24, 0.0  ;;  %v5793_v58 = vpop.f32.mrb[8].mxu0 }
 0x273   :  { %4406 = vst [vmem:[%s8118_s3 + $0x38] sm:$0xff] %v4350_v1  ;;  %v5849_v27 = vadd.f32 %v5793_v58, %v7826_v3  ;;  %v4033_v45 = vpop.f32.mrb[9].mxu0 }
 0x274   :  { %4404 = vst [vmem:[%s8118_s3 + $0x28] sm:$0xff] %v4348_v50  ;;  %v5850_v36 = vadd.f32 %v4033_v45, %v7828_v61  ;;  %v5794_v44 = vpop.f32.mrb[10].mxu0 }
 0x275   :  { %v4297_v57 = vadd.f32 %v5849_v27, %v7869_v32  ;;  %v5851_v7 = vadd.f32 %v5794_v44, %v7830_v34  ;;  %v4036_v11 = vpop.f32.mrb[11].mxu0 }
 0x276   :  { %v4295_v16 = vadd.f32 %v5850_v36, %v7869_v32  ;;  %v5852_v48 = vadd.f32 %v4036_v11, %v7832_v31 }
 0x277   :  { %v4353_v22 = vmax.f32 %v4297_v57, 0.0  ;;  %v4298_v3 = vadd.f32 %v5851_v7, %v7869_v32 }
 0x278   :  { %v4351_v8 = vmax.f32 %v4295_v16, 0.0  ;;  %v4296_v43 = vadd.f32 %v5852_v48, %v7869_v32 }
 0x279   :  { %4409 = vst [vmem:[%s8118_s3 + $0x50] sm:$0xff] %v4353_v22  ;;  %v4354_v61 = vmax.f32 %v4298_v3, 0.0 }
 0x27a   :  { %4407 = vst [vmem:[%s8118_s3 + $0x40] sm:$0xff] %v4351_v8  ;;  %v4352_v34 = vmax.f32 %v4296_v43, 0.0  ;;  %v5797_v51 = vpop.f32.mrb[12].mxu0 }
 0x27b   :  { %4410 = vst [vmem:[%s8118_s3 + $0x58] sm:$0xff] %v4354_v61  ;;  %v5853_v31 = vadd.f32 %v5797_v51, %v7834_v20  ;;  %v4049_v15 = vpop.f32.mrb[13].mxu0 }
 0x27c   :  { %4408 = vst [vmem:[%s8118_s3 + $0x48] sm:$0xff] %v4352_v34  ;;  %v5854_v0 = vadd.f32 %v4049_v15, %v7836_v59  ;;  %v5798_v9 = vpop.f32.mrb[14].mxu0 }
 0x27d   :  { %v4301_v12 = vadd.f32 %v5853_v31, %v7869_v32  ;;  %v5855_v40 = vadd.f32 %v5798_v9, %v7838_v14  ;;  %v4052_v53 = vpop.f32.mrb[15].mxu0 }
 0x27e   :  { %v4299_v2 = vadd.f32 %v5854_v0, %v7869_v32  ;;  %v5856_v21 = vadd.f32 %v4052_v53, %v7840_v39 }
 0x27f   :  { %v4357_v63 = vmax.f32 %v4301_v12, 0.0  ;;  %v4302_v20 = vadd.f32 %v5855_v40, %v7869_v32 }
 0x280   :  { %v4355_v23 = vmax.f32 %v4299_v2, 0.0  ;;  %v4300_v56 = vadd.f32 %v5856_v21, %v7869_v32 }
 0x281   :  { %4413 = vst [vmem:[%s8118_s3 + $0x70] sm:$0xff] %v4357_v63  ;;  %v4358_v59 = vmax.f32 %v4302_v20, 0.0 }
 0x282   :  { %4411 = vst [vmem:[%s8118_s3 + $0x60] sm:$0xff] %v4355_v23  ;;  %v4356_v14 = vmax.f32 %v4300_v56, 0.0  ;;  %v5801_v19 = vpop.f32.mrb[16].mxu0 }
 0x283   :  { %4414 = vst [vmem:[%s8118_s3 + $0x78] sm:$0xff] %v4358_v59  ;;  %v5857_v39 = vadd.f32 %v5801_v19, %v7842_v47  ;;  %v4065_v54 = vpop.f32.mrb[17].mxu0 }
 0x284   :  { %4412 = vst [vmem:[%s8118_s3 + $0x68] sm:$0xff] %v4356_v14  ;;  %v5858_v29 = vadd.f32 %v4065_v54, %v7844_v49  ;;  %v5802_v35 = vpop.f32.mrb[18].mxu0 }
 0x285   :  { %v4305_v5 = vadd.f32 %v5857_v39, %v7869_v32  ;;  %v5859_v10 = vadd.f32 %v5802_v35, %v7846_v52  ;;  %v4068_v25 = vpop.f32.mrb[19].mxu0 }
 0x286   :  { %v4303_v41 = vadd.f32 %v5858_v29, %v7869_v32  ;;  %v5860_v42 = vadd.f32 %v4068_v25, %v7848_v55 }
 0x287   :  { %v4361_v60 = vmax.f32 %v4305_v5, 0.0  ;;  %v4306_v47 = vadd.f32 %v5859_v10, %v7869_v32 }
 0x288   :  { %v4359_v6 = vmax.f32 %v4303_v41, 0.0  ;;  %v4304_v28 = vadd.f32 %v5860_v42, %v7869_v32 }
 0x289   :  { %4417 = vst [vmem:[%s8118_s3 + $0x90] sm:$0xff] %v4361_v60  ;;  %v4362_v49 = vmax.f32 %v4306_v47, 0.0 }
 0x28a   :  { %4415 = vst [vmem:[%s8118_s3 + $0x80] sm:$0xff] %v4359_v6  ;;  %v4360_v52 = vmax.f32 %v4304_v28, 0.0  ;;  %v5805_v4 = vpop.f32.mrb[20].mxu0 }
 0x28b   :  { %4418 = vst [vmem:[%s8118_s3 + $0x98] sm:$0xff] %v4362_v49  ;;  %v5861_v55 = vadd.f32 %v5805_v4, %v7850_v37  ;;  %v4081_v26 = vpop.f32.mrb[21].mxu0 }
 0x28c   :  { %4416 = vst [vmem:[%s8118_s3 + $0x88] sm:$0xff] %v4360_v52  ;;  %v5862_v38 = vadd.f32 %v4081_v26, %v7852_v17  ;;  %v5806_v24 = vpop.f32.mrb[22].mxu0 }
 0x28d   :  { %v4309_v1 = vadd.f32 %v5861_v55, %v7869_v32  ;;  %v5863_v50 = vadd.f32 %v5806_v24, %v7854_v30  ;;  %v4084_v58 = vpop.f32.mrb[23].mxu0 }
 0x28e   :  { %v4307_v27 = vadd.f32 %v5862_v38, %v7869_v32  ;;  %v5864_v45 = vadd.f32 %v4084_v58, %v7856_v62 }
 0x28f   :  { %v4365_v36 = vmax.f32 %v4309_v1, 0.0  ;;  %v4310_v37 = vadd.f32 %v5863_v50, %v7869_v32 }
 0x290   :  { %v4363_v44 = vmax.f32 %v4307_v27, 0.0  ;;  %v4308_v57 = vadd.f32 %v5864_v45, %v7869_v32 }
 0x291   :  { %4421 = vst [vmem:[%s8118_s3 + $0xb0] sm:$0xff] %v4365_v36  ;;  %v4366_v17 = vmax.f32 %v4310_v37, 0.0 }
 0x292   :  { %4419 = vst [vmem:[%s8118_s3 + $0xa0] sm:$0xff] %v4363_v44  ;;  %v4364_v30 = vmax.f32 %v4308_v57, 0.0  ;;  %v5809_v7 = vpop.f32.mrb[24].mxu0 }
 0x293   :  { %4422 = vst [vmem:[%s8118_s3 + $0xb8] sm:$0xff] %v4366_v17  ;;  %v5865_v62 = vadd.f32 %v5809_v7, %v7858_v18  ;;  %v4097_v11 = vpop.f32.mrb[25].mxu0 }
 0x294   :  { %4420 = vst [vmem:[%s8118_s3 + $0xa8] sm:$0xff] %v4364_v30  ;;  %v5866_v16 = vadd.f32 %v4097_v11, %v7860_v13  ;;  %v5810_v48 = vpop.f32.mrb[26].mxu0 }
 0x295   :  { %v4313_v22 = vadd.f32 %v5865_v62, %v7869_v32  ;;  %v5867_v3 = vadd.f32 %v5810_v48, %v7862_v33  ;;  %v4100_v8 = vpop.f32.mrb[27].mxu0 }
 0x296   :  { %v4311_v43 = vadd.f32 %v5866_v16, %v7869_v32  ;;  %v5868_v61 = vadd.f32 %v4100_v8, %v7864_v46 }
 0x297   :  { %v4369_v34 = vmax.f32 %v4313_v22, 0.0  ;;  %v4314_v18 = vadd.f32 %v5867_v3, %v7869_v32 }
 0x298   :  { %v4367_v51 = vmax.f32 %v4311_v43, 0.0  ;;  %v4312_v31 = vadd.f32 %v5868_v61, %v7869_v32 }
 0x299   :  { %4425 = vst [vmem:[%s8118_s3 + $0xd0] sm:$0xff] %v4369_v34  ;;  %v4370_v13 = vmax.f32 %v4314_v18, 0.0  ;;  %v5581_v15 = vpop.f32.mrb[28].mxu1 }
 0x29a   :  { %4423 = vst [vmem:[%s8118_s3 + $0xc0] sm:$0xff] %v4367_v51  ;;  %v4368_v33 = vmax.f32 %v4312_v31, 0.0  ;;  %v5813_v0 = vpop.f32.mrb[28].mxu0  ;;  %v2168_v9 = vpop.f32.mrb[29].mxu1 }
 0x29b   :  { %4426 = vst [vmem:[%s8118_s3 + $0xd8] sm:$0xff] %v4370_v13  ;;  %v5869_v46 = vadd.f32 %v5813_v0, %v5581_v15  ;;  %v4113_v12 = vpop.f32.mrb[29].mxu0  ;;  %v5582_v53 = vpop.f32.mrb[30].mxu1 }
 0x29c   :  { %4424 = vst [vmem:[%s8118_s3 + $0xc8] sm:$0xff] %v4368_v33  ;;  %v5870_v40 = vadd.f32 %v4113_v12, %v2168_v9  ;;  %v5814_v2 = vpop.f32.mrb[30].mxu0  ;;  %v2171_v20 = vpop.f32.mrb[31].mxu1 }
 0x29d   :  { %v4317_v21 = vadd.f32 %v5869_v46, %v7869_v32  ;;  %v5871_v63 = vadd.f32 %v5814_v2, %v5582_v53  ;;  %v4116_v23 = vpop.f32.mrb[31].mxu0 }
 0x29e   :  { %v4315_v56 = vadd.f32 %v5870_v40, %v7869_v32  ;;  %v5872_v59 = vadd.f32 %v4116_v23, %v2171_v20 }
 0x29f   :  { %v4373_v14 = vmax.f32 %v4317_v21, 0.0  ;;  %v4318_v19 = vadd.f32 %v5871_v63, %v7869_v32 }
 0x2a0   :  { %v4371_v39 = vmax.f32 %v4315_v56, 0.0  ;;  %v4316_v54 = vadd.f32 %v5872_v59, %v7869_v32 }
 0x2a1   :  { %4429 = vst [vmem:[%s8118_s3 + $0xf0] sm:$0xff] %v4373_v14  ;;  %v4374_v29 = vmax.f32 %v4318_v19, 0.0  ;;  %v5585_v5 = vpop.f32.mrb[32].mxu1 }
 0x2a2   :  { %4427 = vst [vmem:[%s8118_s3 + $0xe0] sm:$0xff] %v4371_v39  ;;  %v4372_v35 = vmax.f32 %v4316_v54, 0.0  ;;  %v5817_v10 = vpop.f32.mrb[32].mxu0  ;;  %v2184_v41 = vpop.f32.mrb[33].mxu1 }
 0x2a3   :  { %4430 = vst [vmem:[%s8118_s3 + $0xf8] sm:$0xff] %v4374_v29  ;;  %v5873_v25 = vadd.f32 %v5817_v10, %v5585_v5  ;;  %v4129_v42 = vpop.f32.mrb[33].mxu0  ;;  %v5586_v47 = vpop.f32.mrb[34].mxu1 }
 0x2a4   :  { %4428 = vst [vmem:[%s8118_s3 + $0xe8] sm:$0xff] %v4372_v35  ;;  %v5874_v60 = vadd.f32 %v4129_v42, %v2184_v41  ;;  %v5818_v6 = vpop.f32.mrb[34].mxu0  ;;  %v2187_v52 = vpop.f32.mrb[35].mxu1 }
 0x2a5   :  { %v4321_v28 = vadd.f32 %v5873_v25, %v7869_v32  ;;  %v5875_v49 = vadd.f32 %v5818_v6, %v5586_v47  ;;  %v4132_v4 = vpop.f32.mrb[35].mxu0 }
 0x2a6   :  { %v4319_v55 = vadd.f32 %v5874_v60, %v7869_v32  ;;  %v5876_v26 = vadd.f32 %v4132_v4, %v2187_v52 }
 0x2a7   :  { %v4377_v38 = vmax.f32 %v4321_v28, 0.0  ;;  %v4322_v24 = vadd.f32 %v5875_v49, %v7869_v32 }
 0x2a8   :  { %v4375_v1 = vmax.f32 %v4319_v55, 0.0  ;;  %v4320_v50 = vadd.f32 %v5876_v26, %v7869_v32 }
 0x2a9   :  { %4433 = vst [vmem:[%s8118_s3 + $0x110] sm:$0xff] %v4377_v38  ;;  %v4378_v58 = vmax.f32 %v4322_v24, 0.0  ;;  %v5589_v45 = vpop.f32.mrb[36].mxu1 }
 0x2aa   :  { %4431 = vst [vmem:[%s8118_s3 + $0x100] sm:$0xff] %v4375_v1  ;;  %v4376_v27 = vmax.f32 %v4320_v50, 0.0  ;;  %v5821_v36 = vpop.f32.mrb[36].mxu0  ;;  %v2200_v44 = vpop.f32.mrb[37].mxu1 }
 0x2ab   :  { %4434 = vst [vmem:[%s8118_s3 + $0x118] sm:$0xff] %v4378_v58  ;;  %v5877_v37 = vadd.f32 %v5821_v36, %v5589_v45  ;;  %v4145_v57 = vpop.f32.mrb[37].mxu0  ;;  %v5590_v30 = vpop.f32.mrb[38].mxu1 }
 0x2ac   :  { %4432 = vst [vmem:[%s8118_s3 + $0x108] sm:$0xff] %v4376_v27  ;;  %v5878_v17 = vadd.f32 %v4145_v57, %v2200_v44  ;;  %v5822_v7 = vpop.f32.mrb[38].mxu0  ;;  %v2203_v16 = vpop.f32.mrb[39].mxu1 }
 0x2ad   :  { %v4325_v62 = vadd.f32 %v5877_v37, %v7869_v32  ;;  %v5879_v11 = vadd.f32 %v5822_v7, %v5590_v30  ;;  %v4148_v48 = vpop.f32.mrb[39].mxu0 }
 0x2ae   :  { %v4323_v22 = vadd.f32 %v5878_v17, %v7869_v32  ;;  %v5880_v3 = vadd.f32 %v4148_v48, %v2203_v16 }
 0x2af   :  { %v4381_v8 = vmax.f32 %v4325_v62, 0.0  ;;  %v4326_v43 = vadd.f32 %v5879_v11, %v7869_v32 }
 0x2b0   :  { %v4379_v61 = vmax.f32 %v4323_v22, 0.0  ;;  %v4324_v34 = vadd.f32 %v5880_v3, %v7869_v32 }
 0x2b1   :  { %4437 = vst [vmem:[%s8118_s3 + $0x130] sm:$0xff] %v4381_v8  ;;  %v4382_v18 = vmax.f32 %v4326_v43, 0.0  ;;  %v5593_v31 = vpop.f32.mrb[40].mxu1 }
 0x2b2   :  { %4435 = vst [vmem:[%s8118_s3 + $0x120] sm:$0xff] %v4379_v61  ;;  %v4380_v51 = vmax.f32 %v4324_v34, 0.0  ;;  %v5825_v13 = vpop.f32.mrb[40].mxu0  ;;  %v2216_v15 = vpop.f32.mrb[41].mxu1 }
 0x2b3   :  { %4438 = vst [vmem:[%s8118_s3 + $0x138] sm:$0xff] %v4382_v18  ;;  %v5881_v33 = vadd.f32 %v5825_v13, %v5593_v31  ;;  %v4161_v0 = vpop.f32.mrb[41].mxu0  ;;  %v5594_v9 = vpop.f32.mrb[42].mxu1 }
 0x2b4   :  { %4436 = vst [vmem:[%s8118_s3 + $0x128] sm:$0xff] %v4380_v51  ;;  %v5882_v46 = vadd.f32 %v4161_v0, %v2216_v15  ;;  %v5826_v12 = vpop.f32.mrb[42].mxu0  ;;  %v2219_v2 = vpop.f32.mrb[43].mxu1 }
 0x2b5   :  { %v4329_v40 = vadd.f32 %v5881_v33, %v7869_v32  ;;  %v5883_v53 = vadd.f32 %v5826_v12, %v5594_v9  ;;  %v4164_v21 = vpop.f32.mrb[43].mxu0 }
 0x2b6   :  { %v4327_v63 = vadd.f32 %v5882_v46, %v7869_v32  ;;  %v5884_v20 = vadd.f32 %v4164_v21, %v2219_v2 }
 0x2b7   :  { %v4385_v23 = vmax.f32 %v4329_v40, 0.0  ;;  %v4330_v56 = vadd.f32 %v5883_v53, %v7869_v32 }
 0x2b8   :  { %v4383_v59 = vmax.f32 %v4327_v63, 0.0  ;;  %v4328_v14 = vadd.f32 %v5884_v20, %v7869_v32 }
 0x2b9   :  { %4441 = vst [vmem:[%s8118_s3 + $0x150] sm:$0xff] %v4385_v23  ;;  %v4386_v19 = vmax.f32 %v4330_v56, 0.0  ;;  %v5597_v54 = vpop.f32.mrb[44].mxu1 }
 0x2ba   :  { %4439 = vst [vmem:[%s8118_s3 + $0x140] sm:$0xff] %v4383_v59  ;;  %v4384_v39 = vmax.f32 %v4328_v14, 0.0  ;;  %v5829_v29 = vpop.f32.mrb[44].mxu0  ;;  %v2232_v5 = vpop.f32.mrb[45].mxu1 }
 0x2bb   :  { %4442 = vst [vmem:[%s8118_s3 + $0x158] sm:$0xff] %v4386_v19  ;;  %v5885_v35 = vadd.f32 %v5829_v29, %v5597_v54  ;;  %v4177_v10 = vpop.f32.mrb[45].mxu0  ;;  %v5598_v41 = vpop.f32.mrb[46].mxu1 }
 0x2bc   :  { %4440 = vst [vmem:[%s8118_s3 + $0x148] sm:$0xff] %v4384_v39  ;;  %v5886_v25 = vadd.f32 %v4177_v10, %v2232_v5  ;;  %v5830_v42 = vpop.f32.mrb[46].mxu0  ;;  %v2235_v6 = vpop.f32.mrb[47].mxu1 }
 0x2bd   :  { %v4333_v60 = vadd.f32 %v5885_v35, %v7869_v32  ;;  %v5887_v47 = vadd.f32 %v5830_v42, %v5598_v41  ;;  %v4180_v28 = vpop.f32.mrb[47].mxu0 }
 0x2be   :  { %v4331_v49 = vadd.f32 %v5886_v25, %v7869_v32  ;;  %v5888_v52 = vadd.f32 %v4180_v28, %v2235_v6 }
 0x2bf   :  { %v4389_v4 = vmax.f32 %v4333_v60, 0.0  ;;  %v4334_v55 = vadd.f32 %v5887_v47, %v7869_v32 }
 0x2c0   :  { %v4387_v26 = vmax.f32 %v4331_v49, 0.0  ;;  %v4332_v38 = vadd.f32 %v5888_v52, %v7869_v32 }
 0x2c1   :  { %4445 = vst [vmem:[%s8118_s3 + $0x170] sm:$0xff] %v4389_v4  ;;  %v4390_v24 = vmax.f32 %v4334_v55, 0.0  ;;  %v5601_v50 = vpop.f32.mrb[48].mxu1 }
 0x2c2   :  { %4443 = vst [vmem:[%s8118_s3 + $0x160] sm:$0xff] %v4387_v26  ;;  %v4388_v1 = vmax.f32 %v4332_v38, 0.0  ;;  %v5833_v58 = vpop.f32.mrb[48].mxu0  ;;  %v2248_v45 = vpop.f32.mrb[49].mxu1 }
 0x2c3   :  { %4446 = vst [vmem:[%s8118_s3 + $0x178] sm:$0xff] %v4390_v24  ;;  %v5889_v27 = vadd.f32 %v5833_v58, %v5601_v50  ;;  %v4193_v36 = vpop.f32.mrb[49].mxu0  ;;  %v5602_v44 = vpop.f32.mrb[50].mxu1 }
 0x2c4   :  { %4444 = vst [vmem:[%s8118_s3 + $0x168] sm:$0xff] %v4388_v1  ;;  %v5890_v37 = vadd.f32 %v4193_v36, %v2248_v45  ;;  %v5834_v57 = vpop.f32.mrb[50].mxu0  ;;  %v2251_v7 = vpop.f32.mrb[51].mxu1 }
 0x2c5   :  { %v4337_v17 = vadd.f32 %v5889_v27, %v7869_v32  ;;  %v5891_v30 = vadd.f32 %v5834_v57, %v5602_v44  ;;  %v4196_v62 = vpop.f32.mrb[51].mxu0 }
 0x2c6   :  { %v4335_v11 = vadd.f32 %v5890_v37, %v7869_v32  ;;  %v5892_v16 = vadd.f32 %v4196_v62, %v2251_v7 }
 0x2c7   :  { %v4393_v48 = vmax.f32 %v4337_v17, 0.0  ;;  %v4338_v22 = vadd.f32 %v5891_v30, %v7869_v32 }
 0x2c8   :  { %v4391_v3 = vmax.f32 %v4335_v11, 0.0  ;;  %v4336_v8 = vadd.f32 %v5892_v16, %v7869_v32 }
 0x2c9   :  { %4449 = vst [vmem:[%s8118_s3 + $0x190] sm:$0xff] %v4393_v48  ;;  %v4394_v43 = vmax.f32 %v4338_v22, 0.0  ;;  %v5605_v34 = vpop.f32.mrb[52].mxu1 }
 0x2ca   :  { %4447 = vst [vmem:[%s8118_s3 + $0x180] sm:$0xff] %v4391_v3  ;;  %v4392_v61 = vmax.f32 %v4336_v8, 0.0  ;;  %v5837_v18 = vpop.f32.mrb[52].mxu0  ;;  %v2264_v31 = vpop.f32.mrb[53].mxu1 }
 0x2cb   :  { %4450 = vst [vmem:[%s8118_s3 + $0x198] sm:$0xff] %v4394_v43  ;;  %v5893_v51 = vadd.f32 %v5837_v18, %v5605_v34  ;;  %v4209_v13 = vpop.f32.mrb[53].mxu0  ;;  %v5606_v15 = vpop.f32.mrb[54].mxu1 }
 0x2cc   :  { %4448 = vst [vmem:[%s8118_s3 + $0x188] sm:$0xff] %v4392_v61  ;;  %v5894_v33 = vadd.f32 %v4209_v13, %v2264_v31  ;;  %v5838_v0 = vpop.f32.mrb[54].mxu0  ;;  %v2267_v12 = vpop.f32.mrb[55].mxu1 }
 0x2cd   :  { %v4341_v46 = vadd.f32 %v5893_v51, %v7869_v32  ;;  %v5895_v9 = vadd.f32 %v5838_v0, %v5606_v15  ;;  %v4212_v40 = vpop.f32.mrb[55].mxu0 }
 0x2ce   :  { %v4339_v53 = vadd.f32 %v5894_v33, %v7869_v32  ;;  %v5896_v2 = vadd.f32 %v4212_v40, %v2267_v12 }
 0x2cf   :  { %v4397_v21 = vmax.f32 %v4341_v46, 0.0  ;;  %v4342_v63 = vadd.f32 %v5895_v9, %v7869_v32 }
 0x2d0   :  { %v4395_v20 = vmax.f32 %v4339_v53, 0.0  ;;  %v4340_v23 = vadd.f32 %v5896_v2, %v7869_v32 }
 0x2d1   :  { %4453 = vst [vmem:[%s8118_s3 + $0x1b0] sm:$0xff] %v4397_v21  ;;  %v4398_v56 = vmax.f32 %v4342_v63, 0.0 }
 0x2d2   :  { %4451 = vst [vmem:[%s8118_s3 + $0x1a0] sm:$0xff] %v4395_v20  ;;  %v4396_v59 = vmax.f32 %v4340_v23, 0.0 }
 0x2d3   :  { %4454 = vst [vmem:[%s8118_s3 + $0x1b8] sm:$0xff] %v4398_v56 }
 0x2d4   :  { %4452 = vst [vmem:[%s8118_s3 + $0x1a8] sm:$0xff] %v4396_v59 }

</bundles_post_ra>
